<compile_context>
chip_gen: v6e
topology: v6e:2x2x1
jax: 0.10.0
libtpu: 0.0.40
codegen_flags: <defaults>
</compile_context>

<pallas_src>
import functools

import jax
import jax.numpy as jnp
import numpy as np
from jax.experimental import pallas as pl
from jax.experimental.pallas import tpu as pltpu


# ----------------------------- Pallas kernel -------------------------------

def adaptability_kernel(ei_ref, eat_ref, x_ref,
                        we_ref, be_ref,
                        w1_ref, b1_ref,
                        wa_ref, ba_ref,
                        gamma_ref, beta_ref,
                        w2_ref, b2_ref,
                        ws_ref, bs_ref,
                        out_ref,
                        *, graphs_per_block, nodes_per_graph):
    Gb = graphs_per_block
    N = nodes_per_graph
    M = Gb * N                      # packed node rows this grid step
    GbE = ei_ref.shape[-1]          # packed edges this grid step (Gb * E)

    # ---- edge_nn on the VPU: sigmoid(sum_k We[k] * ea[k, :] + be) -> [1, GbE]
    ea = eat_ref[0]                                            # (8, GbE)
    logits = jnp.sum(ea * we_ref[...], axis=0, keepdims=True)  # sublane reduce
    ew = jax.nn.sigmoid(logits + be_ref[0])                    # (1, GbE)

    # ---- block-diagonal normalized adjacency D^-1/2 (A + I) D^-1/2 ----------
    # edge indices were pre-offset by g*N in the wrapper, so one-hot incidences
    # directly give a block-diagonal (M, M) adjacency.
    ei = ei_ref[0]                                             # (2, GbE) int32
    src = ei[0:1, :]                                           # (1, GbE)
    dst = ei[1:2, :]                                           # (1, GbE)
    node_ids = jax.lax.broadcasted_iota(jnp.int32, (M, GbE), 0)
    d_oh = (node_ids == dst).astype(jnp.float32)               # (M, GbE)
    s_oh = (node_ids == src).astype(jnp.float32)               # (M, GbE)

    # degree (weighted, aggregated at dst) + 1.0 self-loop weight  => deg >= 1
    deg = jnp.sum(d_oh * ew, axis=1, keepdims=True) + 1.0      # (M, 1)
    dis = jax.lax.rsqrt(deg)                                   # (M, 1)

    # A_hat[d, s] = dis[d] * (sum_e ew_e [dst_e==d][src_e==s]) * dis[s]
    #             + dis[d]^2 * [d == s]
    a_hat = jax.lax.dot_general(
        (dis * d_oh) * ew, dis * s_oh,
        (((1,), (1,)), ((), ())),
        preferred_element_type=jnp.float32)                    # (M, M)
    row_ids = jax.lax.broadcasted_iota(jnp.int32, (M, M), 0)
    col_ids = jax.lax.broadcasted_iota(jnp.int32, (M, M), 1)
    eye = (row_ids == col_ids).astype(jnp.float32)
    a_hat = a_hat + eye * (dis * dis)

    x = x_ref[...]                                             # (M, F)

    # ---- conv1: A_hat @ (X @ W1) + b1, ReLU (packed 128-row GEMMs) ----------
    h = jnp.dot(a_hat,
                jnp.dot(x, w1_ref[...], preferred_element_type=jnp.float32),
                preferred_element_type=jnp.float32) + b1_ref[...]
    h = jnp.maximum(h, 0.0)
    # dropout (p=0.1) -> identity in eval mode

    # ---- adapt_specific: Linear(H, H) ---------------------------------------
    h = jnp.dot(h, wa_ref[...], preferred_element_type=jnp.float32) + ba_ref[...]

    # ---- adapt_norm: LayerNorm over hidden dim (eps = 1e-5), then ReLU ------
    mean = jnp.mean(h, axis=-1, keepdims=True)
    var = jnp.mean((h - mean) ** 2, axis=-1, keepdims=True)
    h = (h - mean) * jax.lax.rsqrt(var + 1e-5)
    h = h * gamma_ref[...] + beta_ref[...]
    h = jnp.maximum(h, 0.0)

    # ---- conv2: A_hat @ (h @ W2) + b2, ReLU ---------------------------------
    h = jnp.dot(a_hat,
                jnp.dot(h, w2_ref[...], preferred_element_type=jnp.float32),
                preferred_element_type=jnp.float32) + b2_ref[...]
    h = jnp.maximum(h, 0.0)

    # ---- global_mean_pool (per graph) + score head ---------------------------
    gid = jax.lax.broadcasted_iota(jnp.int32, (Gb, M), 0)
    nid = jax.lax.broadcasted_iota(jnp.int32, (Gb, M), 1)
    pool_mat = ((nid >= gid * N) & (nid < (gid + 1) * N)).astype(jnp.float32)
    pool_mat = pool_mat * (1.0 / N)                            # (Gb, M)
    pooled = jnp.dot(pool_mat, h, preferred_element_type=jnp.float32)  # (Gb, H)

    score = (jnp.sum(pooled * ws_ref[...], axis=-1, keepdims=True)
             + bs_ref[0])                                      # (Gb, 1)

    # lane-dense (Gb, 128) store; wrapper slices lane 0
    out_ref[...] = jnp.broadcast_to(score, out_ref.shape)


# ------------------------------ JAX wrappers --------------------------------

def _const_spec(shape):
    """Full-array BlockSpec with a constant index_map (stays VMEM-resident)."""
    nd = len(shape)
    return pl.BlockSpec(shape, lambda s: (0,) * nd)


def adaptability_expert_forward_batched(params, x, edge_index, edge_attr,
                                        *, graphs_per_block=8):
    """Batched forward over G independent graphs.

    x:          [G, N, F] float32
    edge_index: [G, 2, E] int32
    edge_attr:  [G, E, 8] float32
    returns     [G, 1]    float32 scores
    """
    G, N, F = x.shape
    E = edge_index.shape[2]
    H = params["W1"].shape[1]
    Gb = graphs_per_block
    assert Gb % 8 == 0, "graphs_per_block must be a multiple of 8"

    # Pad graph count to a multiple of Gb (dummy graphs produce finite scores
    # that are sliced away below).
    S = -(-G // Gb)                 # number of grid steps (ceil)
    Gp = S * Gb
    if Gp != G:
        pad = Gp - G
        x = jnp.concatenate([x, jnp.zeros((pad, N, F), x.dtype)], axis=0)
        edge_index = jnp.concatenate(
            [edge_index, jnp.zeros((pad, 2, E), edge_index.dtype)], axis=0)
        edge_attr = jnp.concatenate(
            [edge_attr, jnp.zeros((pad, E, 8), edge_attr.dtype)], axis=0)

    M = Gb * N
    GbE = Gb * E

    # Node features packed as (S*M, F) -- Gb graphs stacked per grid step.
    x_flat = x.reshape(S * M, F)

    # Edge indices offset by the within-step graph index (g*N) so every graph
    # occupies its own N-row block of the packed block-diagonal adjacency,
    # then packed as (S, 2, Gb*E) with flat edge order e_flat = g*E + e.
    offs = ((jnp.arange(Gp, dtype=jnp.int32) % Gb) * N)[:, None, None]
    ei_off = edge_index.astype(jnp.int32) + offs                       # (Gp,2,E)
    ei_pack = (ei_off.reshape(S, Gb, 2, E)
               .transpose(0, 2, 1, 3).reshape(S, 2, GbE))

    # Edge attrs packed as (S, 8, Gb*E) matching the flat edge order above.
    ea_pack = (edge_attr.transpose(0, 2, 1).reshape(S, Gb, 8, E)
               .transpose(0, 2, 1, 3).reshape(S, 8, GbE))

    we = params["We"].reshape(8, 1)
    be = params["be"].reshape(1)
    ws = params["Ws"].reshape(1, H)
    bs = params["bs"].reshape(1)

    kernel = functools.partial(adaptability_kernel,
                               graphs_per_block=Gb, nodes_per_graph=N)

    smem = pltpu.MemorySpace.SMEM

    out = pl.pallas_call(
        kernel,
        out_shape=jax.ShapeDtypeStruct((S * Gb, 128), jnp.float32),
        grid_spec=pltpu.PrefetchScalarGridSpec(
            num_scalar_prefetch=0,
            grid=(S,),
            in_specs=[
                pl.BlockSpec((1, 2, GbE), lambda s: (s, 0, 0)),   # packed edge_index
                pl.BlockSpec((1, 8, GbE), lambda s: (s, 0, 0)),   # packed edge_attr^T
                pl.BlockSpec((M, F), lambda s: (s, 0)),           # packed node feats
                _const_spec((8, 1)),                              # We
                pl.BlockSpec(memory_space=smem),                  # be (scalar)
                _const_spec((F, H)), _const_spec((1, H)),         # W1, b1
                _const_spec((H, H)), _const_spec((1, H)),         # Wa, ba
                _const_spec((1, H)), _const_spec((1, H)),         # gamma, beta
                _const_spec((H, H)), _const_spec((1, H)),         # W2, b2
                _const_spec((1, H)),                              # Ws^T
                pl.BlockSpec(memory_space=smem),                  # bs (scalar)
            ],
            out_specs=pl.BlockSpec((Gb, 128), lambda s: (s, 0)),
        ),
        compiler_params=pltpu.CompilerParams(
            dimension_semantics=("parallel",)),
    )(ei_pack, ea_pack, x_flat,
      we, be,
      params["W1"], params["b1"],
      params["Wa"], params["ba"],
      params["gamma"], params["beta"],
      params["W2"], params["b2"],
      ws, bs)

    return out[:G, 0:1]                                          # [G, 1]


def adaptability_expert_forward(params, x, edge_index, edge_attr):
    """Single-graph forward (matches the PyTorch module), returns [1, 1]."""
    out = adaptability_expert_forward_batched(
        params, x[None], edge_index[None], edge_attr[None])
    return out[0:1]


# --------------------------- Pure-JAX reference -----------------------------

def build_normalized_adjacency(edge_index, edge_weight, num_nodes):
    """GCNConv normalization: A_hat = D^-1/2 (A + I) D^-1/2, aggregation at dst."""
    src, dst = edge_index[0], edge_index[1]
    loop = jnp.arange(num_nodes, dtype=edge_index.dtype)
    src_f = jnp.concatenate([src, loop])
    dst_f = jnp.concatenate([dst, loop])
    ew_f = jnp.concatenate([edge_weight, jnp.ones((num_nodes,), jnp.float32)])
    deg = jnp.zeros((num_nodes,), jnp.float32).at[dst_f].add(ew_f)
    dis = jnp.where(deg > 0, jax.lax.rsqrt(deg), 0.0)
    norm = dis[src_f] * ew_f * dis[dst_f]
    A = jnp.zeros((num_nodes, num_nodes), jnp.float32).at[dst_f, src_f].add(norm)
    return A


def reference_forward(params, x, edge_index, edge_attr):
    ew = jax.nn.sigmoid(edge_attr @ params["We"] + params["be"]).reshape(-1)
    A = build_normalized_adjacency(edge_index, ew, x.shape[0])
    h = jnp.maximum(A @ (x @ params["W1"]) + params["b1"], 0.0)
    h = h @ params["Wa"] + params["ba"]
    mean = h.mean(-1, keepdims=True)
    var = ((h - mean) ** 2).mean(-1, keepdims=True)
    h = (h - mean) / jnp.sqrt(var + 1e-5) * params["gamma"] + params["beta"]
    h = jnp.maximum(h, 0.0)
    h = jnp.maximum(A @ (h @ params["W2"]) + params["b2"], 0.0)
    pooled = h.mean(0, keepdims=True)
    return pooled @ params["Ws"] + params["bs"]


# --------------------------------- main -------------------------------------

if __name__ == "__main__":
    key = jax.random.PRNGKey(0)
    # graphs, nodes/graph, node feats, hidden, edges/graph; Gb graphs per step
    G, N, F, H, E = 32, 16, 8, 32, 24
    Gb = 8                       # Gb*N = 128 packed rows per MXU pass

    keys = jax.random.split(key, 12)
    params = {
        "We":    0.2 * jax.random.normal(keys[0], (8, 1), jnp.float32),
        "be":    jnp.zeros((1, 1), jnp.float32),
        "W1":    0.2 * jax.random.normal(keys[1], (F, H), jnp.float32),
        "b1":    0.05 * jax.random.normal(keys[2], (1, H), jnp.float32),
        "Wa":    0.2 * jax.random.normal(keys[3], (H, H), jnp.float32),
        "ba":    0.05 * jax.random.normal(keys[4], (1, H), jnp.float32),
        "gamma": jnp.ones((1, H), jnp.float32),
        "beta":  jnp.zeros((1, H), jnp.float32),
        "W2":    0.2 * jax.random.normal(keys[5], (H, H), jnp.float32),
        "b2":    0.05 * jax.random.normal(keys[6], (1, H), jnp.float32),
        "Ws":    0.2 * jax.random.normal(keys[7], (H, 1), jnp.float32),
        "bs":    0.05 * jax.random.normal(keys[8], (1, 1), jnp.float32),
    }

    xb = jax.random.normal(keys[9], (G, N, F), jnp.float32)
    eib = jax.random.randint(keys[10], (G, 2, E), 0, N, dtype=jnp.int32)
    eab = jax.random.normal(keys[11], (G, E, 8), jnp.float32)

    # Batched (multi-graph) fused kernel: 4 grid steps x 8 graphs.
    scores = adaptability_expert_forward_batched(
        params, xb, eib, eab, graphs_per_block=Gb)
    scores = jax.block_until_ready(scores)

    ref_b = jax.vmap(lambda x, ei, ea: reference_forward(params, x, ei, ea))(
        xb, eib, eab).reshape(G, 1)
    np.testing.assert_allclose(np.asarray(scores), np.asarray(ref_b),
                               rtol=1e-4, atol=1e-4)

    # Single-graph path (module semantics: one graph per forward).
    score0 = adaptability_expert_forward(params, xb[0], eib[0], eab[0])
    score0 = jax.block_until_ready(score0)
    ref0 = reference_forward(params, xb[0], eib[0], eab[0])
    np.testing.assert_allclose(np.asarray(score0), np.asarray(ref0),
                               rtol=1e-4, atol=1e-4)

    print("KERNEL_OK")
</pallas_src>

<mosaic_0001>
module attributes {stable_mosaic.version = 11 : i64} {
  func.func @adaptability_kernel(%arg0: i32, %arg1: memref<1x2x192xi32, #tpu.memory_space<vmem>>, %arg2: memref<1x8x192xf32, #tpu.memory_space<vmem>>, %arg3: memref<128x8xf32, #tpu.memory_space<vmem>>, %arg4: memref<8x1xf32, #tpu.memory_space<vmem>>, %arg5: memref<1xf32, #tpu.memory_space<smem>>, %arg6: memref<8x32xf32, #tpu.memory_space<vmem>>, %arg7: memref<1x32xf32, #tpu.memory_space<vmem>>, %arg8: memref<32x32xf32, #tpu.memory_space<vmem>>, %arg9: memref<1x32xf32, #tpu.memory_space<vmem>>, %arg10: memref<1x32xf32, #tpu.memory_space<vmem>>, %arg11: memref<1x32xf32, #tpu.memory_space<vmem>>, %arg12: memref<32x32xf32, #tpu.memory_space<vmem>>, %arg13: memref<1x32xf32, #tpu.memory_space<vmem>>, %arg14: memref<1x32xf32, #tpu.memory_space<vmem>>, %arg15: memref<1xf32, #tpu.memory_space<smem>>, %arg16: memref<8x128xf32, #tpu.memory_space<vmem>>) attributes {dimension_semantics = [#tpu.dimension_semantics<parallel>], iteration_bounds = array<i64: 4>, scalar_prefetch = 0 : i64, scratch_operands = 0 : i64, tpu.core_type = #tpu.core_type<tc>, window_params = [{transform_indices = @transform_0, window_bounds = array<i64: 1, 2, 192>}, {transform_indices = @transform_1, window_bounds = array<i64: 1, 8, 192>}, {transform_indices = @transform_2, window_bounds = array<i64: 128, 8>}, {pipeline_mode = #tpu.pipeline_mode<synchronous>, transform_indices = @transform_3, window_bounds = array<i64: 8, 1>}, {transform_indices = @transform_4, window_bounds = array<i64: 1>}, {pipeline_mode = #tpu.pipeline_mode<synchronous>, transform_indices = @transform_5, window_bounds = array<i64: 8, 32>}, {pipeline_mode = #tpu.pipeline_mode<synchronous>, transform_indices = @transform_6, window_bounds = array<i64: 1, 32>}, {pipeline_mode = #tpu.pipeline_mode<synchronous>, transform_indices = @transform_7, window_bounds = array<i64: 32, 32>}, {pipeline_mode = #tpu.pipeline_mode<synchronous>, transform_indices = @transform_8, window_bounds = array<i64: 1, 32>}, {pipeline_mode = #tpu.pipeline_mode<synchronous>, transform_indices = @transform_9, window_bounds = array<i64: 1, 32>}, {pipeline_mode = #tpu.pipeline_mode<synchronous>, transform_indices = @transform_10, window_bounds = array<i64: 1, 32>}, {pipeline_mode = #tpu.pipeline_mode<synchronous>, transform_indices = @transform_11, window_bounds = array<i64: 32, 32>}, {pipeline_mode = #tpu.pipeline_mode<synchronous>, transform_indices = @transform_12, window_bounds = array<i64: 1, 32>}, {pipeline_mode = #tpu.pipeline_mode<synchronous>, transform_indices = @transform_13, window_bounds = array<i64: 1, 32>}, {transform_indices = @transform_14, window_bounds = array<i64: 1>}, {transform_indices = @transform_15, window_bounds = array<i64: 8, 128>}]} {
    %c0 = arith.constant 0 : index
    %c0_0 = arith.constant 0 : index
    %c0_1 = arith.constant 0 : index
    %0 = vector.load %arg2[%c0, %c0_0, %c0_1] : memref<1x8x192xf32, #tpu.memory_space<vmem>>, vector<1x8x192xf32>
    %1 = vector.shape_cast %0 : vector<1x8x192xf32> to vector<8x192xf32>
    %c0_2 = arith.constant 0 : index
    %c0_3 = arith.constant 0 : index
    %2 = vector.load %arg4[%c0_2, %c0_3] : memref<8x1xf32, #tpu.memory_space<vmem>>, vector<8x1xf32>
    %3 = vector.broadcast %2 : vector<8x1xf32> to vector<8x192xf32>
    %4 = arith.mulf %1, %3 : vector<8x192xf32>
    %cst = arith.constant dense<0.000000e+00> : vector<192xf32>
    %5 = vector.multi_reduction <add>, %4, %cst [0] : vector<8x192xf32> to vector<192xf32>
    %6 = vector.shape_cast %5 : vector<192xf32> to vector<1x192xf32>
    %c0_4 = arith.constant 0 : index
    %7 = memref.load %arg5[%c0_4] : memref<1xf32, #tpu.memory_space<smem>>
    %8 = vector.broadcast %7 : f32 to vector<1x192xf32>
    %9 = arith.addf %6, %8 : vector<1x192xf32>
    %10 = arith.negf %9 : vector<1x192xf32>
    %11 = math.exp %10 : vector<1x192xf32>
    %cst_5 = arith.constant 1.000000e+00 : f32
    %12 = vector.broadcast %cst_5 : f32 to vector<1x192xf32>
    %13 = arith.addf %12, %11 : vector<1x192xf32>
    %14 = arith.divf %12, %13 : vector<1x192xf32>
    %c0_6 = arith.constant 0 : index
    %c0_7 = arith.constant 0 : index
    %c0_8 = arith.constant 0 : index
    %15 = vector.load %arg1[%c0_6, %c0_7, %c0_8] : memref<1x2x192xi32, #tpu.memory_space<vmem>>, vector<1x2x192xi32>
    %16 = vector.shape_cast %15 : vector<1x2x192xi32> to vector<2x192xi32>
    %17 = vector.extract_strided_slice %16 {offsets = [0, 0], sizes = [1, 192], strides = [1, 1]} : vector<2x192xi32> to vector<1x192xi32>
    %18 = vector.extract_strided_slice %16 {offsets = [1, 0], sizes = [1, 192], strides = [1, 1]} : vector<2x192xi32> to vector<1x192xi32>
    %19 = tpu.iota {dimensions = array<i32: 0>} : vector<128x192xi32>
    %20 = vector.broadcast %18 : vector<1x192xi32> to vector<128x192xi32>
    %21 = arith.cmpi eq, %19, %20 : vector<128x192xi32>
    %22 = arith.extui %21 : vector<128x192xi1> to vector<128x192xi32>
    %23 = arith.sitofp %22 : vector<128x192xi32> to vector<128x192xf32>
    %24 = vector.broadcast %17 : vector<1x192xi32> to vector<128x192xi32>
    %25 = arith.cmpi eq, %19, %24 : vector<128x192xi32>
    %26 = arith.extui %25 : vector<128x192xi1> to vector<128x192xi32>
    %27 = arith.sitofp %26 : vector<128x192xi32> to vector<128x192xf32>
    %28 = vector.broadcast %14 : vector<1x192xf32> to vector<128x192xf32>
    %29 = arith.mulf %23, %28 : vector<128x192xf32>
    %cst_9 = arith.constant dense<0.000000e+00> : vector<128xf32>
    %30 = vector.multi_reduction <add>, %29, %cst_9 [1] : vector<128x192xf32> to vector<128xf32>
    %31 = vector.shape_cast %30 : vector<128xf32> to vector<128x1xf32>
    %cst_10 = arith.constant 1.000000e+00 : f32
    %32 = vector.broadcast %cst_10 : f32 to vector<128x1xf32>
    %33 = arith.addf %31, %32 : vector<128x1xf32>
    %34 = math.rsqrt %33 : vector<128x1xf32>
    %35 = vector.broadcast %34 : vector<128x1xf32> to vector<128x192xf32>
    %36 = arith.mulf %35, %23 : vector<128x192xf32>
    %37 = vector.broadcast %14 : vector<1x192xf32> to vector<128x192xf32>
    %38 = arith.mulf %36, %37 : vector<128x192xf32>
    %39 = vector.broadcast %34 : vector<128x1xf32> to vector<128x192xf32>
    %40 = arith.mulf %39, %27 : vector<128x192xf32>
    %cst_11 = arith.constant dense<0.000000e+00> : vector<128x128xf32>
    %41 = tpu.matmul %38, %40, %cst_11 {dimension_numbers = #tpu.dot_dimension_numbers<[1], [1], [0], [0], [0, 0, 1, 0], [], []>} : vector<128x192xf32>, vector<128x192xf32>, vector<128x128xf32> -> vector<128x128xf32>
    %42 = tpu.iota {dimensions = array<i32: 0>} : vector<128x128xi32>
    %43 = tpu.iota {dimensions = array<i32: 1>} : vector<128x128xi32>
    %44 = arith.cmpi eq, %42, %43 : vector<128x128xi32>
    %45 = arith.extui %44 : vector<128x128xi1> to vector<128x128xi32>
    %46 = arith.sitofp %45 : vector<128x128xi32> to vector<128x128xf32>
    %47 = arith.mulf %34, %34 : vector<128x1xf32>
    %48 = vector.broadcast %47 : vector<128x1xf32> to vector<128x128xf32>
    %49 = arith.mulf %46, %48 : vector<128x128xf32>
    %50 = arith.addf %41, %49 : vector<128x128xf32>
    %c0_12 = arith.constant 0 : index
    %c0_13 = arith.constant 0 : index
    %51 = vector.load %arg3[%c0_12, %c0_13] : memref<128x8xf32, #tpu.memory_space<vmem>>, vector<128x8xf32>
    %c0_14 = arith.constant 0 : index
    %c0_15 = arith.constant 0 : index
    %52 = vector.load %arg6[%c0_14, %c0_15] : memref<8x32xf32, #tpu.memory_space<vmem>>, vector<8x32xf32>
    %cst_16 = arith.constant dense<0.000000e+00> : vector<128x32xf32>
    %53 = tpu.matmul %51, %52, %cst_16 {dimension_numbers = #tpu.dot_dimension_numbers<[1], [0], [0], [1], [0, 0, 1, 1], [], []>} : vector<128x8xf32>, vector<8x32xf32>, vector<128x32xf32> -> vector<128x32xf32>
    %cst_17 = arith.constant dense<0.000000e+00> : vector<128x32xf32>
    %54 = tpu.matmul %50, %53, %cst_17 {dimension_numbers = #tpu.dot_dimension_numbers<[1], [0], [0], [1], [0, 0, 1, 1], [], []>} : vector<128x128xf32>, vector<128x32xf32>, vector<128x32xf32> -> vector<128x32xf32>
    %c0_18 = arith.constant 0 : index
    %c0_19 = arith.constant 0 : index
    %55 = vector.load %arg7[%c0_18, %c0_19] : memref<1x32xf32, #tpu.memory_space<vmem>>, vector<1x32xf32>
    %56 = vector.broadcast %55 : vector<1x32xf32> to vector<128x32xf32>
    %57 = arith.addf %54, %56 : vector<128x32xf32>
    %cst_20 = arith.constant 0.000000e+00 : f32
    %58 = vector.broadcast %cst_20 : f32 to vector<128x32xf32>
    %59 = arith.maximumf %57, %58 : vector<128x32xf32>
    %c0_21 = arith.constant 0 : index
    %c0_22 = arith.constant 0 : index
    %60 = vector.load %arg8[%c0_21, %c0_22] : memref<32x32xf32, #tpu.memory_space<vmem>>, vector<32x32xf32>
    %cst_23 = arith.constant dense<0.000000e+00> : vector<128x32xf32>
    %61 = tpu.matmul %59, %60, %cst_23 {dimension_numbers = #tpu.dot_dimension_numbers<[1], [0], [0], [1], [0, 0, 1, 1], [], []>} : vector<128x32xf32>, vector<32x32xf32>, vector<128x32xf32> -> vector<128x32xf32>
    %c0_24 = arith.constant 0 : index
    %c0_25 = arith.constant 0 : index
    %62 = vector.load %arg9[%c0_24, %c0_25] : memref<1x32xf32, #tpu.memory_space<vmem>>, vector<1x32xf32>
    %63 = vector.broadcast %62 : vector<1x32xf32> to vector<128x32xf32>
    %64 = arith.addf %61, %63 : vector<128x32xf32>
    %cst_26 = arith.constant dense<0.000000e+00> : vector<128xf32>
    %65 = vector.multi_reduction <add>, %64, %cst_26 [1] : vector<128x32xf32> to vector<128xf32>
    %66 = vector.shape_cast %65 : vector<128xf32> to vector<128x1xf32>
    %cst_27 = arith.constant 3.200000e+01 : f32
    %67 = vector.broadcast %cst_27 : f32 to vector<128x1xf32>
    %68 = arith.divf %66, %67 : vector<128x1xf32>
    %69 = vector.broadcast %68 : vector<128x1xf32> to vector<128x32xf32>
    %70 = arith.subf %64, %69 : vector<128x32xf32>
    %71 = arith.mulf %70, %70 : vector<128x32xf32>
    %cst_28 = arith.constant dense<0.000000e+00> : vector<128xf32>
    %72 = vector.multi_reduction <add>, %71, %cst_28 [1] : vector<128x32xf32> to vector<128xf32>
    %73 = vector.shape_cast %72 : vector<128xf32> to vector<128x1xf32>
    %cst_29 = arith.constant 3.200000e+01 : f32
    %74 = vector.broadcast %cst_29 : f32 to vector<128x1xf32>
    %75 = arith.divf %73, %74 : vector<128x1xf32>
    %76 = vector.broadcast %68 : vector<128x1xf32> to vector<128x32xf32>
    %77 = arith.subf %64, %76 : vector<128x32xf32>
    %cst_30 = arith.constant 9.99999974E-6 : f32
    %78 = vector.broadcast %cst_30 : f32 to vector<128x1xf32>
    %79 = arith.addf %75, %78 : vector<128x1xf32>
    %80 = math.rsqrt %79 : vector<128x1xf32>
    %81 = vector.broadcast %80 : vector<128x1xf32> to vector<128x32xf32>
    %82 = arith.mulf %77, %81 : vector<128x32xf32>
    %c0_31 = arith.constant 0 : index
    %c0_32 = arith.constant 0 : index
    %83 = vector.load %arg10[%c0_31, %c0_32] : memref<1x32xf32, #tpu.memory_space<vmem>>, vector<1x32xf32>
    %84 = vector.broadcast %83 : vector<1x32xf32> to vector<128x32xf32>
    %85 = arith.mulf %82, %84 : vector<128x32xf32>
    %c0_33 = arith.constant 0 : index
    %c0_34 = arith.constant 0 : index
    %86 = vector.load %arg11[%c0_33, %c0_34] : memref<1x32xf32, #tpu.memory_space<vmem>>, vector<1x32xf32>
    %87 = vector.broadcast %86 : vector<1x32xf32> to vector<128x32xf32>
    %88 = arith.addf %85, %87 : vector<128x32xf32>
    %cst_35 = arith.constant 0.000000e+00 : f32
    %89 = vector.broadcast %cst_35 : f32 to vector<128x32xf32>
    %90 = arith.maximumf %88, %89 : vector<128x32xf32>
    %c0_36 = arith.constant 0 : index
    %c0_37 = arith.constant 0 : index
    %91 = vector.load %arg12[%c0_36, %c0_37] : memref<32x32xf32, #tpu.memory_space<vmem>>, vector<32x32xf32>
    %cst_38 = arith.constant dense<0.000000e+00> : vector<128x32xf32>
    %92 = tpu.matmul %90, %91, %cst_38 {dimension_numbers = #tpu.dot_dimension_numbers<[1], [0], [0], [1], [0, 0, 1, 1], [], []>} : vector<128x32xf32>, vector<32x32xf32>, vector<128x32xf32> -> vector<128x32xf32>
    %cst_39 = arith.constant dense<0.000000e+00> : vector<128x32xf32>
    %93 = tpu.matmul %50, %92, %cst_39 {dimension_numbers = #tpu.dot_dimension_numbers<[1], [0], [0], [1], [0, 0, 1, 1], [], []>} : vector<128x128xf32>, vector<128x32xf32>, vector<128x32xf32> -> vector<128x32xf32>
    %c0_40 = arith.constant 0 : index
    %c0_41 = arith.constant 0 : index
    %94 = vector.load %arg13[%c0_40, %c0_41] : memref<1x32xf32, #tpu.memory_space<vmem>>, vector<1x32xf32>
    %95 = vector.broadcast %94 : vector<1x32xf32> to vector<128x32xf32>
    %96 = arith.addf %93, %95 : vector<128x32xf32>
    %cst_42 = arith.constant 0.000000e+00 : f32
    %97 = vector.broadcast %cst_42 : f32 to vector<128x32xf32>
    %98 = arith.maximumf %96, %97 : vector<128x32xf32>
    %99 = tpu.iota {dimensions = array<i32: 0>} : vector<8x128xi32>
    %100 = tpu.iota {dimensions = array<i32: 1>} : vector<8x128xi32>
    %c16_i32 = arith.constant 16 : i32
    %101 = vector.broadcast %c16_i32 : i32 to vector<8x128xi32>
    %102 = arith.muli %99, %101 : vector<8x128xi32>
    %103 = arith.cmpi sge, %100, %102 : vector<8x128xi32>
    %c1_i32 = arith.constant 1 : i32
    %104 = vector.broadcast %c1_i32 : i32 to vector<8x128xi32>
    %105 = arith.addi %99, %104 : vector<8x128xi32>
    %c16_i32_43 = arith.constant 16 : i32
    %106 = vector.broadcast %c16_i32_43 : i32 to vector<8x128xi32>
    %107 = arith.muli %105, %106 : vector<8x128xi32>
    %108 = arith.cmpi slt, %100, %107 : vector<8x128xi32>
    %109 = arith.andi %103, %108 : vector<8x128xi1>
    %110 = arith.extui %109 : vector<8x128xi1> to vector<8x128xi32>
    %111 = arith.sitofp %110 : vector<8x128xi32> to vector<8x128xf32>
    %cst_44 = arith.constant 6.250000e-02 : f32
    %112 = vector.broadcast %cst_44 : f32 to vector<8x128xf32>
    %113 = arith.mulf %111, %112 : vector<8x128xf32>
    %cst_45 = arith.constant dense<0.000000e+00> : vector<8x32xf32>
    %114 = tpu.matmul %113, %98, %cst_45 {dimension_numbers = #tpu.dot_dimension_numbers<[1], [0], [0], [1], [0, 0, 1, 1], [], []>} : vector<8x128xf32>, vector<128x32xf32>, vector<8x32xf32> -> vector<8x32xf32>
    %c0_46 = arith.constant 0 : index
    %c0_47 = arith.constant 0 : index
    %115 = vector.load %arg14[%c0_46, %c0_47] : memref<1x32xf32, #tpu.memory_space<vmem>>, vector<1x32xf32>
    %116 = vector.broadcast %115 : vector<1x32xf32> to vector<8x32xf32>
    %117 = arith.mulf %114, %116 : vector<8x32xf32>
    %cst_48 = arith.constant dense<0.000000e+00> : vector<8xf32>
    %118 = vector.multi_reduction <add>, %117, %cst_48 [1] : vector<8x32xf32> to vector<8xf32>
    %119 = vector.shape_cast %118 : vector<8xf32> to vector<8x1xf32>
    %c0_49 = arith.constant 0 : index
    %120 = memref.load %arg15[%c0_49] : memref<1xf32, #tpu.memory_space<smem>>
    %121 = vector.broadcast %120 : f32 to vector<8x1xf32>
    %122 = arith.addf %119, %121 : vector<8x1xf32>
    %123 = vector.shape_cast %122 : vector<8x1xf32> to vector<8x1xf32>
    %124 = vector.broadcast %123 : vector<8x1xf32> to vector<8x128xf32>
    %c0_50 = arith.constant 0 : index
    %c0_51 = arith.constant 0 : index
    %125 = vector.load %arg16[%c0_50, %c0_51] : memref<8x128xf32, #tpu.memory_space<vmem>>, vector<8x128xf32>
    tpu.vector_store %arg16[%c0_50, %c0_51], %124 {strides = array<i32>} : memref<8x128xf32, #tpu.memory_space<vmem>>, vector<8x128xf32>,
    return
  }
  func.func @transform_0(%arg0: i32) -> (i32, i32, i32) {
    %c0_i32 = arith.constant 0 : i32
    %c0_i32_0 = arith.constant 0 : i32
    %c0_i32_1 = arith.constant 0 : i32
    return %arg0, %c0_i32, %c0_i32_0 : i32, i32, i32
  }
  func.func @transform_1(%arg0: i32) -> (i32, i32, i32) {
    %c0_i32 = arith.constant 0 : i32
    %c0_i32_0 = arith.constant 0 : i32
    %c0_i32_1 = arith.constant 0 : i32
    return %arg0, %c0_i32, %c0_i32_0 : i32, i32, i32
  }
  func.func @transform_2(%arg0: i32) -> (i32, i32) {
    %c0_i32 = arith.constant 0 : i32
    %c0_i32_0 = arith.constant 0 : i32
    return %arg0, %c0_i32 : i32, i32
  }
  func.func @transform_3(%arg0: i32) -> (i32, i32) {
    %c0_i32 = arith.constant 0 : i32
    %c0_i32_0 = arith.constant 0 : i32
    %c0_i32_1 = arith.constant 0 : i32
    return %c0_i32, %c0_i32_0 : i32, i32
  }
  func.func @transform_4(%arg0: i32) -> i32 {
    %c0_i32 = arith.constant 0 : i32
    %c0_i32_0 = arith.constant 0 : i32
    return %c0_i32 : i32
  }
  func.func @transform_5(%arg0: i32) -> (i32, i32) {
    %c0_i32 = arith.constant 0 : i32
    %c0_i32_0 = arith.constant 0 : i32
    %c0_i32_1 = arith.constant 0 : i32
    return %c0_i32, %c0_i32_0 : i32, i32
  }
  func.func @transform_6(%arg0: i32) -> (i32, i32) {
    %c0_i32 = arith.constant 0 : i32
    %c0_i32_0 = arith.constant 0 : i32
    %c0_i32_1 = arith.constant 0 : i32
    return %c0_i32, %c0_i32_0 : i32, i32
  }
  func.func @transform_7(%arg0: i32) -> (i32, i32) {
    %c0_i32 = arith.constant 0 : i32
    %c0_i32_0 = arith.constant 0 : i32
    %c0_i32_1 = arith.constant 0 : i32
    return %c0_i32, %c0_i32_0 : i32, i32
  }
  func.func @transform_8(%arg0: i32) -> (i32, i32) {
    %c0_i32 = arith.constant 0 : i32
    %c0_i32_0 = arith.constant 0 : i32
    %c0_i32_1 = arith.constant 0 : i32
    return %c0_i32, %c0_i32_0 : i32, i32
  }
  func.func @transform_9(%arg0: i32) -> (i32, i32) {
    %c0_i32 = arith.constant 0 : i32
    %c0_i32_0 = arith.constant 0 : i32
    %c0_i32_1 = arith.constant 0 : i32
    return %c0_i32, %c0_i32_0 : i32, i32
  }
  func.func @transform_10(%arg0: i32) -> (i32, i32) {
    %c0_i32 = arith.constant 0 : i32
    %c0_i32_0 = arith.constant 0 : i32
    %c0_i32_1 = arith.constant 0 : i32
    return %c0_i32, %c0_i32_0 : i32, i32
  }
  func.func @transform_11(%arg0: i32) -> (i32, i32) {
    %c0_i32 = arith.constant 0 : i32
    %c0_i32_0 = arith.constant 0 : i32
    %c0_i32_1 = arith.constant 0 : i32
    return %c0_i32, %c0_i32_0 : i32, i32
  }
  func.func @transform_12(%arg0: i32) -> (i32, i32) {
    %c0_i32 = arith.constant 0 : i32
    %c0_i32_0 = arith.constant 0 : i32
    %c0_i32_1 = arith.constant 0 : i32
    return %c0_i32, %c0_i32_0 : i32, i32
  }
  func.func @transform_13(%arg0: i32) -> (i32, i32) {
    %c0_i32 = arith.constant 0 : i32
    %c0_i32_0 = arith.constant 0 : i32
    %c0_i32_1 = arith.constant 0 : i32
    return %c0_i32, %c0_i32_0 : i32, i32
  }
  func.func @transform_14(%arg0: i32) -> i32 {
    %c0_i32 = arith.constant 0 : i32
    %c0_i32_0 = arith.constant 0 : i32
    return %c0_i32 : i32
  }
  func.func @transform_15(%arg0: i32) -> (i32, i32) {
    %c0_i32 = arith.constant 0 : i32
    %c0_i32_0 = arith.constant 0 : i32
    return %arg0, %c0_i32 : i32, i32
  }
}

</mosaic_0001>

<bundles_post_ra>
// kernel: tpu_custom_call.1
= control target key start
LH: loop header
LB: loop body
LE: loop exit
PB: predicated region body
PF: predicated region fallthrough
CT: control target
= control target key end

     0   :  { %s4841_s0 = inlined_call_operand.vmem [shape: s32[4,2,192], index: 0, kind: input, shape index: {}]   ;;  %s4842_s1 = inlined_call_operand.vmem [shape: f32[4,8,192], index: 1, kind: input, shape index: {}]   ;;  %s4843_s2 = inlined_call_operand.vmem [shape: f32[512,8], index: 2, kind: input, shape index: {}]   ;;  %s4844_s3 = inlined_call_operand.vmem [shape: f32[8,1], index: 3, kind: input, shape index: {}]   ;;  %s4845_s4 = inlined_call_operand.<no memory space> [shape: f32[1], index: 4, kind: input, shape index: {}]   ;;  %s4846_s5 = inlined_call_operand.vmem [shape: f32[8,32], index: 5, kind: input, shape index: {}]   ;;  %s4847_s6 = inlined_call_operand.vmem [shape: f32[1,32], index: 6, kind: input, shape index: {}]   ;;  %s4848_s7 = inlined_call_operand.vmem [shape: f32[32,32], index: 7, kind: input, shape index: {}]   ;;  %s4849_s8 = inlined_call_operand.vmem [shape: f32[1,32], index: 8, kind: input, shape index: {}]   ;;  %s4850_s9 = inlined_call_operand.vmem [shape: f32[1,32], index: 9, kind: input, shape index: {}]   ;;  %s4851_s10 = inlined_call_operand.vmem [shape: f32[1,32], index: 10, kind: input, shape index: {}]   ;;  %s4852_s11 = inlined_call_operand.vmem [shape: f32[32,32], index: 11, kind: input, shape index: {}]   ;;  %s4853_s12 = inlined_call_operand.vmem [shape: f32[1,32], index: 12, kind: input, shape index: {}]   ;;  %s4854_s13 = inlined_call_operand.vmem [shape: f32[1,32], index: 13, kind: input, shape index: {}]   ;;  %s4855_s14 = inlined_call_operand.<no memory space> [shape: f32[1], index: 14, kind: input, shape index: {}]   ;;  %s4856_s15 = inlined_call_operand.hbm [shape: f32[32,128], index: 15, kind: output, shape index: {}]  }
   0x1   :  { %4880 = sst [smem:[#allocation26_spill]] %s4841_s0 }
   0x2   :  { %4881 = sst [smem:[#allocation27_spill]] %s4842_s1 }
   0x3   :  { %4882 = sst [smem:[#allocation28_spill]] %s4843_s2 }
   0x4   :  { %4883 = sst [smem:[#allocation29_spill]] %s4844_s3 }
   0x5   :  { %4884 = sst [smem:[#allocation30_spill]] %s4846_s5 }
   0x6   :  { %20 = sst [smem:[#allocation2]] %s4845_s4 }
   0x7   :  { %21 = sst [smem:[#allocation3]] %s4855_s14 }
   0x8   :  { %22 = vsyncpa [#allocation5], 0 }
   0x9   :  { %24 = vsyncpa [#allocation5 + $0x1], 0  ;;  %s3605_s22 = smov 0   ;;  %s3607_s23 = smov 0  }
   0xa   :  { %s3609_s24 = smov 0   ;;  %s3611_s25 = smov 0  }
   0xb LB: > { %s3626_s4 = sadd.s32 4294967295, %s3513_s25   ;;  %s2777_s14 = sadd.s32 4294967294, %s3513_s25   ;;  %s3513_s25 = sphi %s3611_s25, %s4937_s25   ;;  %s3509_s24 = sphi %s3609_s24, %s4936_s24   ;;  %s3505_s23 = sphi %s3607_s23, %s4935_s23   ;;  %s3501_s22 = sphi %s3605_s22, %s4934_s22  }
   0xc   : > { %s3630_s26 = sadd.s32 1, %s3513_s25   ;;  %s367_s27 = sadd.s32 1, %s3509_s24 }
   0xd   : > { %s364_s28 = ssub.s32 %s3513_s25, %s3630_s26  ;;  %p377_p0 = scmp.ne.s32.totalorder %s3509_s24, %s3505_s23 }
   0xe   : > { %p365_p1 = scmp.eq.s32.totalorder %s364_s28, 0  ;;  %p378_p2 = scmp.eq.s32.totalorder %s3626_s4, 3 }
   0xf   : > { %p383_p3 = scmp.ne.s32.totalorder %s3505_s23, %s3501_s22  ;;  %p384_p4 = scmp.eq.s32.totalorder %s2777_s14, 3 }
  0x10   : > { %s3641_s29 = scalar_select %p365_p1, %s3509_s24, %s367_s27  }
  0x11   : > { %p3643_p5 = por %p378_p2, %p377_p0  ;;  %p3647_p6 = por %p384_p4, %p383_p3 }
  0x12   : > { %p2780_p7 = scmp.ge.s32.totalorder %s3513_s25, 1  ;;  %p463_p8 = scmp.lt.s32.totalorder %s3513_s25, 5 }
  0x14   : > { %p464_p9 = pnand %p2780_p7, %p463_p8 }
  0x16   : > { %467 = sbr.rel (%p464_p9) target bundleno = 2225 (0x8b1), region = 80 }
  0x1b   : > { %s4887_s3 = sld [smem:[#allocation29_spill]]  ;;  %v3515_v1 = vmov 0   ;;  %s2786_s21 = sshll.u32 %s3626_s4, 4  ;;  %vm1383_vm0 = vcmask 64512   ;;  %vm553_vm1 = vcmask 523264   ;;  %v4857_v28 = vlaneseq }
  0x1c   : > { %3380 = vset.pattern.permute.xlu0 %v3515_v1  ;;  %s4888_s5 = sld [smem:[#allocation30_spill]]  ;;  %p532_p10 = scmp.lt.s32.totalorder %s2786_s21, 63  ;;  %v4858_v47 = vmov 0.0  }
  0x1d   : > { %s4889_s2 = sld [smem:[#allocation28_spill]]  ;;  %p521_p11 = scmp.lt.s32.totalorder %s3626_s4, 3  ;;  %v3680_v29 = vshrl.u32 %v4857_v28, 7 }
  0x1e   : > { %s4939_s21 = smov (!%p532_p10, %s2786_s21), 63  ;;  %s4890_s1 = sld [smem:[#allocation27_spill]] }
  0x1f   : > { %s2787_s14 = sshll.u32 %s4939_s21, 3  ;;  %s4891_s0 = sld [smem:[#allocation26_spill]]  ;;  %v597_v30 = vsub.s32 1, %v3680_v29  ;;  %v601_v31 = vsub.s32 3, %v3680_v29  ;;  %v3696_v41 = vadd.s32 120, %v3680_v29  ;;  %v3699_v42 = vadd.s32 112, %v3680_v29 }
  0x20   : > { %s3671_s18 = scalar_select %p521_p11, %s3626_s4, 3  ;;  %v3702_v43 = vadd.s32 104, %v3680_v29  ;;  %v3705_v44 = vadd.s32 40, %v3680_v29  ;;  %v3708_v45 = vadd.s32 96, %v3680_v29  ;;  %v3721_v46 = vadd.s32 24, %v3680_v29 }
  0x21   : > { %v539_v0 = vld [vmem:[%s4887_s3] sm:$0xff]  ;;  %4892 = vst [vmem:[#allocation7_spill] sm:$0xff] %v3696_v41  ;;  %4893 = vst [vmem:[#allocation8_spill] sm:$0xff] %v3699_v42  ;;  %v3754_v55 = vadd.s32 88, %v3680_v29  ;;  %v3757_v56 = vadd.s32 8, %v3680_v29  ;;  %s2676_s20 = sld [smem:[#allocation3]] }
  0x22   : > { %542 = vperm.xlu0 %3380, %v539_v0   ;;  %v1382_v2 = vld [vmem:[%s4888_s5] sm:$0xff]  ;;  %s2962_s19 = sshll.u32 %s3671_s18, 4  ;;  %4894 = vst [vmem:[#allocation9_spill] sm:$0xff] %v3702_v43  ;;  %4895 = vst [vmem:[#allocation10_spill] sm:$0xff] %v3705_v44 }
  0x23   : > { %3101 = vmatprep.subr.mxu1 %v1382_v2  ;;  %s3663_s17 = scalar_lea.vmem %s4889_s2, %s2787_s14  ;;  %s561_s14 = sld [smem:[#allocation2]]  ;;  %4896 = vst [vmem:[#allocation11_spill] sm:$0xff] %v3708_v45  ;;  %4897 = vst [vmem:[#allocation12_spill] sm:$0xff] %v3721_v46 }
  0x24   : > { %3102 = vmatpush3.msra.mxu1 %v1382_v2  ;;  %v1366_v3 = vld [vmem:[%s3663_s17] sm:$0xff]  ;;  %v1367_v4 = vld [vmem:[%s3663_s17 + $0x8] sm:$0xff]  ;;  %s530_s3 = scalar_lea.vmem %s4890_s1, %s2962_s19  ;;  %4900 = vst [vmem:[#allocation15_spill] sm:$0xff] %v3754_v55  ;;  %4901 = vst [vmem:[#allocation16_spill] sm:$0xff] %v3757_v56  ;;  %s3518_s2 = smov [#allocation4]  }
  0x25   : > { %3103 = vmatprep.mubr.msk.f32.mxu1 %vm1383_vm0, %v1366_v3  ;;  %v537_v5 = vld [vmem:[%s530_s3] sm:$0xff]  ;;  %v538_v6 = vld [vmem:[%s530_s3 + $0x8] sm:$0xff]  ;;  %s2961_s3 = sshll.u32 %s3671_s18, 2  ;;  %s518_s18 = sand.u32 1, %s3505_s23  }
  0x26   : > { %3104 = vmatmul.mubr.msk.f32.vlgmr.msra.gmra.mxu1 %vm1383_vm0, %v1367_v4  ;;  %s525_s19 = scalar_lea.vmem %s4891_s0, %s2961_s3  ;;  %v3786_v4 = vadd.s32 80, %v3680_v29  ;;  %s2781_s21 = sshll.u32 %s518_s18, 3 }
  0x27   : > { %v3687_v33 = vld [vmem:[%s525_s19] sm:$0xf]  ;;  %s520_s3 = scalar_lea.vmem [#allocation4], %s2781_s21  ;;  %s3457_s5 = sshll.u32 %s3518_s2, 4  ;;  %s3458_s5 = int_to_ptr.vmem [resolvable:$false] %s3457_s5 }
  0x28   : > { %v598_v37 = vrot.slane %v3687_v33, %v597_v30  ;;  %v602_v38 = vrot.slane %v3687_v33, %v601_v31  ;;  %4902 = vst [vmem:[#allocation17_spill] sm:$0xff] %v3786_v4  ;;  %s2694_s27 = sshll.u32 %s520_s3, 4  ;;  %s2695_s27 = int_to_ptr.vmem [resolvable:$true] %s2694_s27 }
  0x29   : > { %v562_v20 = vstv %s561_s14  ;;  %s2958_s14 = sshll.u32 %s3626_s4, 7  ;;  %s3453_s1 = scalar_lea.vmem %s2695_s27, 128 }
  0x2a   : > { %v3691_v39 = vrot.slane %v598_v37, %v597_v30  ;;  %v3693_v40 = vrot.slane %v602_v38, %v597_v30  ;;  %s2692_s19 = scalar_lea.hbm %s4856_s15, %s2958_s14  ;;  %p3454_p12 = scmp.ne.s32.totalorder %s2695_s27, %s3453_s1 }
  0x2b   : > { %s3459_s4 = scalar_lea.vmem %s3458_s5, 256  ;;  %p3460_p1 = scmp.lt.s32.totalorder %s2695_s27, %s3458_s5 }
  0x2c   : > { %vm641_vm2 = vcmp.eq.s32.totalorder %v3696_v41, %v3691_v39  ;;  %vm642_vm3 = vcmp.eq.s32.totalorder %v3696_v41, %v3693_v40  ;;  %vm640_vm4 = vcmp.eq.s32.totalorder %v3699_v42, %v3693_v40  ;;  %vm638_vm5 = vcmp.eq.s32.totalorder %v3702_v43, %v3693_v40  ;;  %p3455_p13 = pnand %p3454_p12, %p3643_p5  ;;  %p3461_p2 = scmp.lt.s32.totalorder %s3459_s4, %s3453_s1 }
  0x2d   : > { %vm622_vm6 = vcmp.eq.s32.totalorder %v3705_v44, %v3693_v40  ;;  %vm639_vm7 = vcmp.eq.s32.totalorder %v3699_v42, %v3691_v39  ;;  %v3726_v48 = vsel %vm641_vm2, 1.0, %v4858_v47  ;;  %vm637_vm8 = vcmp.eq.s32.totalorder %v3702_v43, %v3691_v39 }
  0x2e   : > { %4898 = vst [vmem:[#allocation13_spill] sm:$0xff] %v3726_v48  ;;  %vm621_vm9 = vcmp.eq.s32.totalorder %v3705_v44, %v3691_v39  ;;  %vm636_vm10 = vcmp.eq.s32.totalorder %v3708_v45, %v3693_v40  ;;  %v3735_v49 = vsel %vm642_vm3, 1.0, %v4858_v47  ;;  %v3738_v50 = vsel %vm640_vm4, 1.0, %v4858_v47  ;;  %p3456_p0 = pneg %p3455_p13  ;;  %p3462_p3 = por %p3461_p2, %p3460_p1 }
  0x2f   : > { %4899 = vst [vmem:[#allocation14_spill] sm:$0xff] %v3735_v49  ;;  %v3741_v51 = vsel %vm638_vm5, 1.0, %v4858_v47  ;;  %v3744_v52 = vsel %vm622_vm6, 1.0, %v4858_v47  ;;  %v3749_v54 = vsel %vm639_vm7, 1.0, %v4858_v47  ;;  %vm618_vm11 = vcmp.eq.s32.totalorder %v3721_v46, %v3693_v40 }
  0x30   : > { %v3762_v58 = vsel %vm637_vm8, 1.0, %v4858_v47  ;;  %v3765_v59 = vsel %vm621_vm9, 1.0, %v4858_v47  ;;  %v3768_v60 = vsel %vm636_vm10, 1.0, %v4858_v47  ;;  %v3783_v3 = vsel %vm618_vm11, 1.0, %v4858_v47  ;;  %p3463_p4 = pnand %p3462_p3, %p3456_p0 }
  0x31   : > { %vm634_vm12 = vcmp.eq.s32.totalorder %v3754_v55, %v3693_v40  ;;  %vm614_vm13 = vcmp.eq.s32.totalorder %v3757_v56, %v3693_v40  ;;  %vm635_vm14 = vcmp.eq.s32.totalorder %v3708_v45, %v3691_v39  ;;  %vm617_vm15 = vcmp.eq.s32.totalorder %v3721_v46, %v3691_v39 }
  0x32   : > { %vm632_vm2 = vcmp.eq.s32.totalorder %v3786_v4, %v3693_v40  ;;  %vm633_vm3 = vcmp.eq.s32.totalorder %v3754_v55, %v3691_v39  ;;  %vm613_vm4 = vcmp.eq.s32.totalorder %v3757_v56, %v3691_v39  ;;  %vm631_vm6 = vcmp.eq.s32.totalorder %v3786_v4, %v3691_v39 }
  0x33   : > { %v3840_v30 = vsel %vm632_vm2, 1.0, %v4858_v47  ;;  %v3843_v31 = vsel %vm633_vm3, 1.0, %v4858_v47  ;;  %vm612_vm3 = vcmp.eq.s32.totalorder %v3680_v29, %v3693_v40 }
  0x9d   : > { %v543_v7 = vpop.permute.xlu0 %542 }
  0x9e   : > { %v545_v8 = vmul.f32 %v543_v7, %v537_v5  ;;  %v546_v9 = vmul.f32 %v543_v7, %v538_v6 }
  0xa0   : > { %v547_v10 = vrot.slane %v545_v8, 4  ;;  %v554_v11 = vsel %vm553_vm1, %v546_v9, 0.0 }
  0xa1   : > { %v555_v12 = vrot.slane %v554_v11, 4 }
  0xa2   : > { %v548_v13 = vadd.f32 %v547_v10, %v545_v8 }
  0xa3   : > { %v556_v14 = vadd.f32 %v555_v12, %v554_v11 }
  0xa4   : > { %v549_v15 = vrot.slane %v548_v13, 2 }
  0xa5   : > { %v557_v16 = vrot.slane %v556_v14, 2 }
  0xa6   : > { %v550_v17 = vadd.f32 %v549_v15, %v548_v13  ;;  %v3809_v15 = vsel %vm634_vm12, 1.0, %v4858_v47 }
  0xa7   : > { %v558_v18 = vadd.f32 %v557_v16, %v556_v14  ;;  %v3812_v16 = vsel %vm614_vm13, 1.0, %v4858_v47 }
  0xa8   : > { %v551_v19 = vrot.slane %v550_v17, 1 }
  0xa9   : > { %v559_v21 = vrot.slane %v558_v18, 1 }
  0xaa   : > { %v552_v22 = vadd.f32 %v551_v19, %v550_v17  ;;  %v3815_v17 = vsel %vm635_vm14, 1.0, %v4858_v47  ;;  %v3823_v19 = vadd.s32 72, %v3680_v29 }
  0xab   : > { %v560_v23 = vadd.f32 %v559_v21, %v558_v18  ;;  %v3818_v18 = vsel %vm617_vm15, 1.0, %v4858_v47 }
  0xac   : > { %v563_v24 = vadd.f32 %v562_v20, %v552_v22  ;;  %4903 = vst [vmem:[#allocation18_spill] sm:$0xff] %v3823_v19  ;;  %vm630_vm5 = vcmp.eq.s32.totalorder %v3823_v19, %v3693_v40  ;;  %vm629_vm8 = vcmp.eq.s32.totalorder %v3823_v19, %v3691_v39 }
  0xad   : > { %v564_v25 = vadd.f32 %v562_v20, %v560_v23 }
  0xae   : > { %v2788_v26 = vmul.f32 -1.442695, %v563_v24 }
  0xaf   : > { %v2789_v27 = vmul.f32 -1.442695, %v564_v25 }
  0xb0   : > { %3381 = vpow2.f32 %v2788_v26 }
  0xb1   : > { %3383 = vpow2.f32 %v2789_v27 }
  0xbd   : > { %v3382_v32 = vpop.eup %3381 }
  0xbe   : > { %v3384_v34 = vpop.eup %3383  ;;  %v571_v35 = vadd.f32 1.0, %v3382_v32  ;;  %v3846_v32 = vsel %vm613_vm4, 1.0, %v4858_v47 }
  0xbf   : > { %v572_v36 = vadd.f32 1.0, %v3384_v34  ;;  %v3851_v34 = vadd.s32 64, %v3680_v29 }
  0xc0   : > { %3385 = vrcp.f32 %v571_v35 }
  0xc1   : > { %3387 = vrcp.f32 %v572_v36  ;;  %4904 = vst [vmem:[#allocation19_spill] sm:$0xff] %v3851_v34  ;;  %vm628_vm7 = vcmp.eq.s32.totalorder %v3851_v34, %v3693_v40  ;;  %vm627_vm10 = vcmp.eq.s32.totalorder %v3851_v34, %v3691_v39 }
  0xcd   : > { %v3746_v53 = vpop.eup %3385 }
  0xce   : > { %v3759_v57 = vpop.eup %3387  ;;  %v849_v1 = vmul.f32 %v3746_v53, %v3726_v48  ;;  %v847_v2 = vmul.f32 %v3746_v53, %v3749_v54  ;;  %v845_v13 = vmul.f32 %v3746_v53, %v3762_v58  ;;  %v829_v14 = vmul.f32 %v3746_v53, %v3765_v59 }
  0xcf   : > { %v850_v61 = vmul.f32 %v3759_v57, %v3735_v49  ;;  %v848_v62 = vmul.f32 %v3759_v57, %v3738_v50  ;;  %v846_v63 = vmul.f32 %v3759_v57, %v3741_v51  ;;  %v830_v0 = vmul.f32 %v3759_v57, %v3744_v52 }
  0xd0   : > { %v844_v11 = vmul.f32 %v3759_v57, %v3768_v60  ;;  %v826_v12 = vmul.f32 %v3759_v57, %v3783_v3  ;;  %v842_v24 = vmul.f32 %v3759_v57, %v3809_v15  ;;  %v822_v25 = vmul.f32 %v3759_v57, %v3812_v16 }
  0xd1   : > { %v911_v5 = vsel %vm553_vm1, %v850_v61, 0.0  ;;  %v907_v6 = vsel %vm553_vm1, %v848_v62, 0.0  ;;  %v903_v9 = vsel %vm553_vm1, %v846_v63, 0.0  ;;  %v871_v10 = vsel %vm553_vm1, %v830_v0, 0.0 }
  0xd2   : > { %v912_v7 = vadd.f32 %v911_v5, %v849_v1  ;;  %v908_v8 = vadd.f32 %v907_v6, %v847_v2  ;;  %v904_v20 = vadd.f32 %v903_v9, %v845_v13  ;;  %v872_v21 = vadd.f32 %v871_v10, %v829_v14  ;;  %v1368_v13 = vld [vmem:[%s3663_s17 + $0x10] sm:$0xff]  ;;  %v1369_v14 = vld [vmem:[%s3663_s17 + $0x18] sm:$0xff] }
  0xd3   : > { %v899_v22 = vsel %vm553_vm1, %v844_v11, 0.0  ;;  %v863_v23 = vsel %vm553_vm1, %v826_v12, 0.0  ;;  %v843_v26 = vmul.f32 %v3746_v53, %v3815_v17  ;;  %v825_v27 = vmul.f32 %v3746_v53, %v3818_v18  ;;  %3106 = vmatprep.mubr.msk.f32.mxu1 %vm1383_vm0, %v1368_v13 }
  0xd4   : > { %913 = vadd.xlane.f32.xlu0 %v912_v7  ;;  %909 = vadd.xlane.f32.xlu1 %v908_v8  ;;  %v895_v37 = vsel %vm553_vm1, %v842_v24, 0.0  ;;  %v855_v38 = vsel %vm553_vm1, %v822_v25, 0.0  ;;  %v840_v61 = vmul.f32 %v3759_v57, %v3840_v30  ;;  %v841_v62 = vmul.f32 %v3746_v53, %v3843_v31 }
  0xd5   : > { %v900_v35 = vadd.f32 %v899_v22, %v843_v26  ;;  %v864_v36 = vadd.f32 %v863_v23, %v825_v27  ;;  %v821_v63 = vmul.f32 %v3746_v53, %v3846_v32  ;;  %v3864_v0 = vsel %vm630_vm5, 1.0, %v4858_v47  ;;  %3107 = vmatmul.mubr.msk.f32.gmra.mxu1 %vm1383_vm0, %v1369_v14  ;;  %v1370_v27 = vld [vmem:[%s3663_s17 + $0x20] sm:$0xff] }
  0xd6   : > { %v3867_v1 = vsel %vm631_vm6, 1.0, %v4858_v47  ;;  %v3872_v2 = vadd.s32 56, %v3680_v29  ;;  %v896_v5 = vadd.f32 %v895_v37, %v841_v62  ;;  %v891_v7 = vsel %vm553_vm1, %v840_v61, 0.0  ;;  %3109 = vmatprep.mubr.msk.f32.mxu1 %vm1383_vm0, %v1370_v27 }
  0xd7   : > { %v856_v6 = vadd.f32 %v855_v38, %v821_v63  ;;  %v838_v8 = vmul.f32 %v3759_v57, %v3864_v0  ;;  %v839_v9 = vmul.f32 %v3746_v53, %v3867_v1  ;;  %v3882_v10 = vsel %vm628_vm7, 1.0, %v4858_v47 }
  0xd8   : > { %905 = vadd.xlane.f32.xlu1 %v904_v20  ;;  %873 = vadd.xlane.f32.xlu0 %v872_v21  ;;  %4905 = vst [vmem:[#allocation20_spill] sm:$0xff] %v3872_v2  ;;  %v3885_v11 = vsel %vm629_vm8, 1.0, %v4858_v47  ;;  %vm626_vm9 = vcmp.eq.s32.totalorder %v3872_v2, %v3693_v40  ;;  %v3890_v12 = vadd.s32 48, %v3680_v29  ;;  %v836_v22 = vmul.f32 %v3759_v57, %v3882_v10 }
  0xd9   : > { %v892_v20 = vadd.f32 %v891_v7, %v839_v9  ;;  %v887_v21 = vsel %vm553_vm1, %v838_v8, 0.0  ;;  %v837_v23 = vmul.f32 %v3746_v53, %v3885_v11  ;;  %v3904_v24 = vsel %vm626_vm9, 1.0, %v4858_v47  ;;  %v1373_v7 = vld [vmem:[%s3663_s17 + $0x38] sm:$0xff] }
  0xda   : > { %4906 = vst [vmem:[#allocation21_spill] sm:$0xff] %v3890_v12  ;;  %v3907_v25 = vsel %vm627_vm10, 1.0, %v4858_v47  ;;  %vm624_vm11 = vcmp.eq.s32.totalorder %v3890_v12, %v3693_v40  ;;  %v3912_v26 = vadd.s32 32, %v3680_v29  ;;  %vm625_vm12 = vcmp.eq.s32.totalorder %v3872_v2, %v3691_v39 }
  0xdb   : > { %v883_v37 = vsel %vm553_vm1, %v836_v22, 0.0  ;;  %v834_v38 = vmul.f32 %v3759_v57, %v3904_v24  ;;  %v835_v61 = vmul.f32 %v3746_v53, %v3907_v25  ;;  %v3926_v62 = vsel %vm624_vm11, 1.0, %v4858_v47  ;;  %v1374_v22 = vld [vmem:[%s3663_s17 + $0x40] sm:$0xff] }
  0xdc   : > { %901 = vadd.xlane.f32.xlu1 %v900_v35  ;;  %865 = vadd.xlane.f32.xlu0 %v864_v36  ;;  %4907 = vst [vmem:[#allocation22_spill] sm:$0xff] %v3912_v26  ;;  %v1371_v35 = vld [vmem:[%s3663_s17 + $0x28] sm:$0xff]  ;;  %v888_v36 = vadd.f32 %v887_v21, %v837_v23  ;;  %v3929_v63 = vsel %vm625_vm12, 1.0, %v4858_v47  ;;  %vm620_vm13 = vcmp.eq.s32.totalorder %v3912_v26, %v3693_v40 }
  0xdd   : > { %3110 = vmatmul.mubr.msk.f32.gmra.mxu1 %vm1383_vm0, %v1371_v35  ;;  %v884_v8 = vadd.f32 %v883_v37, %v835_v61  ;;  %vm623_vm14 = vcmp.eq.s32.totalorder %v3890_v12, %v3691_v39  ;;  %v879_v9 = vsel %vm553_vm1, %v834_v38, 0.0  ;;  %v832_v13 = vmul.f32 %v3759_v57, %v3926_v62  ;;  %v1375_v23 = vld [vmem:[%s3663_s17 + $0x48] sm:$0xff]  ;;  %v1376_v61 = vld [vmem:[%s3663_s17 + $0x50] sm:$0xff] }
  0xde   : > { %v833_v14 = vmul.f32 %v3746_v53, %v3929_v63  ;;  %v3951_v21 = vsel %vm623_vm14, 1.0, %v4858_v47  ;;  %vm619_vm2 = vcmp.eq.s32.totalorder %v3912_v26, %v3691_v39  ;;  %vm611_vm5 = vcmp.eq.s32.totalorder %v3680_v29, %v3691_v39 }
  0xdf   : > { %v875_v35 = vsel %vm553_vm1, %v832_v13, 0.0  ;;  %v831_v37 = vmul.f32 %v3746_v53, %v3951_v21  ;;  %v4005_v28 = vsel %vm611_vm5, 1.0, %v4858_v47 }
  0xe0   : > { %897 = vadd.xlane.f32.xlu1 %v896_v5  ;;  %857 = vadd.xlane.f32.xlu0 %v856_v6  ;;  %v3934_v5 = vadd.s32 16, %v3680_v29  ;;  %v1372_v6 = vld [vmem:[%s3663_s17 + $0x30] sm:$0xff]  ;;  %v880_v27 = vadd.f32 %v879_v9, %v833_v14 }
  0xe1   : > { %3112 = vmatprep.mubr.msk.f32.mxu1 %vm1383_vm0, %v1372_v6  ;;  %v1377_v6 = vld [vmem:[%s3663_s17 + $0x58] sm:$0xff] }
  0xe2   : > { %4908 = vst [vmem:[#allocation23_spill] sm:$0xff] %v3934_v5  ;;  %3113 = vmatmul.mubr.msk.f32.gmra.mxu1 %vm1383_vm0, %v1373_v7  ;;  %vm616_vm15 = vcmp.eq.s32.totalorder %v3934_v5, %v3693_v40  ;;  %v3972_v7 = vsel %vm619_vm2, 1.0, %v4858_v47  ;;  %vm615_vm4 = vcmp.eq.s32.totalorder %v3934_v5, %v3691_v39  ;;  %v3986_v40 = vsel %vm612_vm3, 1.0, %v4858_v47 }
  0xe3   : > { %3115 = vmatprep.mubr.msk.f32.mxu1 %vm1383_vm0, %v1374_v22  ;;  %v3967_v38 = vsel %vm616_vm15, 1.0, %v4858_v47  ;;  %v827_v14 = vmul.f32 %v3746_v53, %v3972_v7  ;;  %v1378_v22 = vld [vmem:[%s3663_s17 + $0x60] sm:$0xff] }
  0xe4   : > { %893 = vadd.xlane.f32.xlu1 %v892_v20  ;;  %v3948_v20 = vsel %vm620_vm13, 1.0, %v4858_v47  ;;  %v824_v13 = vmul.f32 %v3759_v57, %v3967_v38 }
  0xe6   : > { %3116 = vmatmul.mubr.msk.f32.gmra.mxu1 %vm1383_vm0, %v1375_v23  ;;  %v1379_v23 = vld [vmem:[%s3663_s17 + $0x68] sm:$0xff] }
  0xe7   : > { %3118 = vmatprep.mubr.msk.f32.mxu1 %vm1383_vm0, %v1376_v61 }
  0xe8   : > { %889 = vadd.xlane.f32.xlu1 %v888_v36  ;;  %v828_v36 = vmul.f32 %v3759_v57, %v3948_v20 }
  0xea   : > { %v867_v9 = vsel %vm553_vm1, %v828_v36, 0.0  ;;  %3119 = vmatmul.mubr.msk.f32.gmra.mxu1 %vm1383_vm0, %v1377_v6  ;;  %v859_v36 = vsel %vm553_vm1, %v824_v13, 0.0  ;;  %v1380_v6 = vld [vmem:[%s3663_s17 + $0x70] sm:$0xff]  ;;  %v819_v13 = vmul.f32 %v3746_v53, %v4005_v28 }
  0xeb   : > { %3121 = vmatprep.mubr.msk.f32.mxu1 %vm1383_vm0, %v1378_v22  ;;  %v709_v22 = vsub.s32 0, %v3680_v29 }
  0xec   : > { %885 = vadd.xlane.f32.xlu1 %v884_v8  ;;  %v876_v8 = vadd.f32 %v875_v35, %v831_v37  ;;  %v868_v35 = vadd.f32 %v867_v9, %v827_v14  ;;  %v820_v37 = vmul.f32 %v3759_v57, %v3986_v40 }
  0xee   : > { %3122 = vmatmul.mubr.msk.f32.gmra.mxu1 %vm1383_vm0, %v1379_v23  ;;  %v851_v39 = vsel %vm553_vm1, %v820_v37, 0.0  ;;  %v713_v23 = vsub.s32 2, %v3680_v29 }
  0xef   : > { %3124 = vmatprep.mubr.msk.f32.mxu1 %vm1383_vm0, %v1380_v6  ;;  %v852_v14 = vadd.f32 %v851_v39, %v819_v13 }
  0xf0   : > { %881 = vadd.xlane.f32.xlu1 %v880_v27  ;;  %v3991_v27 = vsel %vm615_vm4, 1.0, %v4858_v47  ;;  %v714_v37 = vrot.slane %v3687_v33, %v713_v23 }
  0xf1   : > { %v823_v61 = vmul.f32 %v3746_v53, %v3991_v27 }
  0xf3   : > { %v860_v9 = vadd.f32 %v859_v36, %v823_v61  ;;  %v710_v36 = vrot.slane %v3687_v33, %v709_v22 }
  0xf4   : > { %877 = vadd.xlane.f32.xlu1 %v876_v8  ;;  %v1381_v8 = vld [vmem:[%s3663_s17 + $0x78] sm:$0xff]  ;;  %s2681_s17 = scalar_lea.sflag [#allocation5], %s518_s18 }
  0xf5   : > { %3125 = vmatmul.mubr.msk.f32.gmra.mxu1 %vm1383_vm0, %v1381_v8  ;;  %v4016_v8 = vrot.slane %v710_v36, %v709_v22 }
  0xf7   : > { %vm753_vm6 = vcmp.eq.s32.totalorder %v3696_v41, %v4016_v8  ;;  %vm751_vm8 = vcmp.eq.s32.totalorder %v3699_v42, %v4016_v8  ;;  %vm749_vm10 = vcmp.eq.s32.totalorder %v3702_v43, %v4016_v8  ;;  %vm747_vm12 = vcmp.eq.s32.totalorder %v3708_v45, %v4016_v8 }
  0xf8   : > { %869 = vadd.xlane.f32.xlu1 %v868_v35  ;;  %vm745_vm14 = vcmp.eq.s32.totalorder %v3754_v55, %v4016_v8  ;;  %vm743_vm2 = vcmp.eq.s32.totalorder %v3786_v4, %v4016_v8  ;;  %vm741_vm4 = vcmp.eq.s32.totalorder %v3823_v19, %v4016_v8 }
  0xfc   : > { %861 = vadd.xlane.f32.xlu1 %v860_v9  ;;  %v4018_v9 = vrot.slane %v714_v37, %v709_v22 }
  0xfe   : > { %vm754_vm0 = vcmp.eq.s32.totalorder %v3696_v41, %v4018_v9  ;;  %vm752_vm7 = vcmp.eq.s32.totalorder %v3699_v42, %v4018_v9  ;;  %vm750_vm9 = vcmp.eq.s32.totalorder %v3702_v43, %v4018_v9  ;;  %vm748_vm11 = vcmp.eq.s32.totalorder %v3708_v45, %v4018_v9 }
  0xff   : > { %vm746_vm13 = vcmp.eq.s32.totalorder %v3754_v55, %v4018_v9  ;;  %vm744_vm15 = vcmp.eq.s32.totalorder %v3786_v4, %v4018_v9  ;;  %vm742_vm3 = vcmp.eq.s32.totalorder %v3823_v19, %v4018_v9  ;;  %vm740_vm5 = vcmp.eq.s32.totalorder %v3851_v34, %v4018_v9 }
 0x100   : > { %853 = vadd.xlane.f32.xlu1 %v852_v14 }
 0x15d   : > { %v914_v35 = vpop.xlane.xlu0 %913  ;;  %v910_v47 = vpop.xlane.xlu1 %909 }
 0x15e   : > { %v930_v48 = vadd.f32 1.0, %v914_v35  ;;  %v929_v49 = vadd.f32 1.0, %v910_v47 }
 0x160   : > { %3389 = vrsqrt.f32 %v930_v48  ;;  %v4909_v48 = vmov 0.0  }
 0x161   : > { %3391 = vrsqrt.f32 %v929_v49  ;;  %v906_v61 = vpop.xlane.xlu1 %905  ;;  %v2853_v49 = vsel %vm754_vm0, 1.0, %v4909_v48  ;;  %v2852_v14 = vsel %vm753_vm6, 1.0, %v4909_v48  ;;  %v2851_v35 = vsel %vm752_vm7, 1.0, %v4909_v48 }
 0x162   : > { %v928_v6 = vadd.f32 1.0, %v906_v61  ;;  %v2847_v41 = vsel %vm748_vm11, 1.0, %v4909_v48  ;;  %v2845_v42 = vsel %vm746_vm13, 1.0, %v4909_v48  ;;  %v2843_v45 = vsel %vm744_vm15, 1.0, %v4909_v48 }
 0x163   : > { %v2841_v4 = vsel %vm742_vm3, 1.0, %v4909_v48  ;;  %v2839_v19 = vsel %vm740_vm5, 1.0, %v4909_v48  ;;  %vm739_vm0 = vcmp.eq.s32.totalorder %v3851_v34, %v4016_v8  ;;  %vm738_vm6 = vcmp.eq.s32.totalorder %v3872_v2, %v4018_v9 }
 0x164   : > { %3393 = vrsqrt.f32 %v928_v6  ;;  %vm737_vm7 = vcmp.eq.s32.totalorder %v3872_v2, %v4016_v8  ;;  %vm733_vm11 = vcmp.eq.s32.totalorder %v3705_v44, %v4016_v8  ;;  %vm731_vm13 = vcmp.eq.s32.totalorder %v3912_v26, %v4016_v8 }
 0x165   : > { %v902_v39 = vpop.xlane.xlu1 %901  ;;  %vm729_vm15 = vcmp.eq.s32.totalorder %v3721_v46, %v4016_v8  ;;  %vm727_vm3 = vcmp.eq.s32.totalorder %v3934_v5, %v4016_v8  ;;  %vm725_vm5 = vcmp.eq.s32.totalorder %v3757_v56, %v4016_v8 }
 0x166   : > { %v927_v13 = vadd.f32 1.0, %v902_v39  ;;  %v2828_v2 = vsel %vm729_vm15, 1.0, %v4909_v48 }
 0x168   : > { %3395 = vrsqrt.f32 %v927_v13  ;;  %v2850_v13 = vsel %vm751_vm8, 1.0, %v4909_v48  ;;  %vm736_vm8 = vcmp.eq.s32.totalorder %v3890_v12, %v4018_v9 }
 0x169   : > { %v898_v47 = vpop.xlane.xlu1 %897 }
 0x16a   : > { %v926_v33 = vadd.f32 1.0, %v898_v47 }
 0x16c   : > { %3397 = vrsqrt.f32 %v926_v33 }
 0x16d   : > { %v4028_v22 = vpop.eup %3389  ;;  %v894_v23 = vpop.xlane.xlu1 %893 }
 0x16e   : > { %4910 = vst [vmem:[#allocation24_spill] sm:$0xff] %v4028_v22  ;;  %v4033_v36 = vpop.eup %3391  ;;  %v925_v37 = vadd.f32 1.0, %v894_v23  ;;  %v1042_v61 = vmul.f32 %v4028_v22, %v2853_v49  ;;  %v1041_v6 = vmul.f32 %v4028_v22, %v2852_v14  ;;  %v2849_v23 = vsel %vm750_vm9, 1.0, %v4909_v48 }
 0x16f   : > { %v1040_v39 = vmul.f32 %v4033_v36, %v2851_v35  ;;  %v1039_v14 = vmul.f32 %v4033_v36, %v2850_v13  ;;  %v2837_v22 = vsel %vm738_vm6, 1.0, %v4909_v48  ;;  %vm735_vm9 = vcmp.eq.s32.totalorder %v3890_v12, %v4016_v8 }
 0x170   : > { %3399 = vrsqrt.f32 %v925_v37  ;;  %2870 = vmatprep.subr.msk.mxu0 %vm553_vm1, %v1042_v61  ;;  %v2848_v37 = vsel %vm749_vm10, 1.0, %v4909_v48  ;;  %vm734_vm10 = vcmp.eq.s32.totalorder %v3705_v44, %v4018_v9  ;;  %vm723_vm6 = vcmp.eq.s32.totalorder %v3680_v29, %v4016_v8 }
 0x171   : > { %v4042_v47 = vpop.eup %3393  ;;  %1222 = vmatpush1.xpose.msra.mxu0 %v1041_v6  ;;  %v890_v33 = vpop.xlane.xlu1 %889 }
 0x172   : > { %v924_v49 = vadd.f32 1.0, %v890_v33  ;;  %2871 = vmatprep.subr.msk.mxu0 %vm553_vm1, %v1040_v39  ;;  %v1038_v35 = vmul.f32 %v4042_v47, %v2849_v23  ;;  %v1037_v13 = vmul.f32 %v4042_v47, %v2848_v37  ;;  %v2846_v23 = vsel %vm747_vm12, 1.0, %v4909_v48 }
 0x173   : > { %vm732_vm12 = vcmp.eq.s32.totalorder %v3912_v26, %v4018_v9 }
 0x174   : > { %3401 = vrsqrt.f32 %v924_v49 }
 0x175   : > { %v4053_v61 = vpop.eup %3395  ;;  %1224 = vmatpush1.xpose.msra.mxu0 %v1039_v14  ;;  %v886_v6 = vpop.xlane.xlu1 %885 }
 0x176   : > { %v923_v39 = vadd.f32 1.0, %v886_v6  ;;  %2872 = vmatprep.subr.msk.mxu0 %vm553_vm1, %v1038_v35  ;;  %v1036_v33 = vmul.f32 %v4053_v61, %v2847_v41  ;;  %v1035_v37 = vmul.f32 %v4053_v61, %v2846_v23  ;;  %v2844_v6 = vsel %vm745_vm14, 1.0, %v4909_v48 }
 0x177   : > { %vm730_vm14 = vcmp.eq.s32.totalorder %v3721_v46, %v4018_v9 }
 0x178   : > { %3403 = vrsqrt.f32 %v923_v39 }
 0x179   : > { %v4064_v49 = vpop.eup %3397  ;;  %1226 = vmatpush1.xpose.msra.mxu0 %v1037_v13  ;;  %v882_v14 = vpop.xlane.xlu1 %881 }
 0x17a   : > { %v922_v35 = vadd.f32 1.0, %v882_v14  ;;  %2873 = vmatprep.subr.msk.mxu0 %vm553_vm1, %v1036_v33  ;;  %v1034_v41 = vmul.f32 %v4064_v49, %v2845_v42  ;;  %v874_v13 = vpop.xlane.xlu0 %873  ;;  %v1033_v42 = vmul.f32 %v4064_v49, %v2844_v6 }
 0x17b   : > { %v920_v23 = vadd.f32 1.0, %v874_v13  ;;  %v2840_v13 = vsel %vm741_vm4, 1.0, %v4909_v48  ;;  %vm726_vm4 = vcmp.eq.s32.totalorder %v3757_v56, %v4018_v9 }
 0x17c   : > { %3405 = vrsqrt.f32 %v922_v35  ;;  %v2842_v35 = vsel %vm743_vm2, 1.0, %v4909_v48  ;;  %vm728_vm2 = vcmp.eq.s32.totalorder %v3934_v5, %v4018_v9  ;;  %v2825_v44 = vsel %vm726_vm4, 1.0, %v4909_v48 }
 0x17d   : > { %v4075_v39 = vpop.eup %3399  ;;  %1228 = vmatpush1.xpose.msra.mxu0 %v1035_v37  ;;  %v878_v43 = vpop.xlane.xlu1 %877 }
 0x17e   : > { %v921_v33 = vadd.f32 1.0, %v878_v43  ;;  %2874 = vmatprep.subr.msk.mxu0 %vm553_vm1, %v1034_v41  ;;  %v1032_v14 = vmul.f32 %v4075_v39, %v2843_v45  ;;  %v1031_v43 = vmul.f32 %v4075_v39, %v2842_v35  ;;  %v866_v45 = vpop.xlane.xlu0 %865 }
 0x180   : > { %3407 = vrsqrt.f32 %v921_v33 }
 0x181   : > { %v4086_v37 = vpop.eup %3401  ;;  %1230 = vmatpush1.xpose.msra.mxu0 %v1033_v42  ;;  %v870_v55 = vpop.xlane.xlu1 %869  ;;  %3409 = vrsqrt.f32 %v920_v23  ;;  %v918_v23 = vadd.f32 1.0, %v866_v45 }
 0x182   : > { %2875 = vmatprep.subr.msk.mxu0 %vm553_vm1, %v1032_v14  ;;  %v919_v41 = vadd.f32 1.0, %v870_v55  ;;  %v1030_v6 = vmul.f32 %v4086_v37, %v2841_v4  ;;  %v1029_v55 = vmul.f32 %v4086_v37, %v2840_v13  ;;  %v2838_v14 = vsel %vm739_vm0, 1.0, %v4909_v48  ;;  %v858_v34 = vpop.xlane.xlu0 %857 }
 0x183   : > { %v2836_v13 = vsel %vm737_vm7, 1.0, %v4909_v48  ;;  %vm724_vm0 = vcmp.eq.s32.totalorder %v3680_v29, %v4018_v9 }
 0x184   : > { %3411 = vrsqrt.f32 %v919_v41 }
 0x185   : > { %v4097_v33 = vpop.eup %3403  ;;  %1232 = vmatpush1.xpose.msra.mxu0 %v1031_v43  ;;  %v862_v42 = vpop.xlane.xlu1 %861  ;;  %3413 = vrsqrt.f32 %v918_v23  ;;  %v916_v23 = vadd.f32 1.0, %v858_v34 }
 0x186   : > { %2876 = vmatprep.subr.msk.mxu0 %vm553_vm1, %v1030_v6  ;;  %v1028_v4 = vmul.f32 %v4097_v33, %v2839_v19  ;;  %v1027_v19 = vmul.f32 %v4097_v33, %v2838_v14  ;;  %v917_v45 = vadd.f32 1.0, %v862_v42 }
 0x189   : > { %v4108_v35 = vpop.eup %3405  ;;  %1234 = vmatpush1.xpose.msra.mxu0 %v1029_v55  ;;  %v854_v43 = vpop.xlane.xlu1 %853 }
 0x18a   : > { %v915_v6 = vadd.f32 1.0, %v854_v43  ;;  %2877 = vmatprep.subr.msk.mxu0 %vm553_vm1, %v1028_v4  ;;  %v1026_v41 = vmul.f32 %v4108_v35, %v2837_v22  ;;  %v2835_v43 = vsel %vm736_vm8, 1.0, %v4909_v48  ;;  %v1025_v42 = vmul.f32 %v4108_v35, %v2836_v13 }
 0x18b   : > { %v2834_v4 = vsel %vm735_vm9, 1.0, %v4909_v48  ;;  %v2831_v13 = vsel %vm732_vm12, 1.0, %v4909_v48 }
 0x18c   : > { %3415 = vrsqrt.f32 %v915_v6  ;;  %v2833_v6 = vsel %vm734_vm10, 1.0, %v4909_v48 }
 0x18d   : > { %v4119_v55 = vpop.eup %3407  ;;  %1236 = vmatpush1.xpose.msra.mxu0 %v1027_v19  ;;  %3417 = vrsqrt.f32 %v917_v45  ;;  %v2832_v45 = vsel %vm733_vm11, 1.0, %v4909_v48 }
 0x18e   : > { %2878 = vmatprep.subr.msk.mxu0 %vm553_vm1, %v1026_v41  ;;  %v1024_v22 = vmul.f32 %v4119_v55, %v2835_v43  ;;  %v4130_v14 = vpop.eup %3409  ;;  %v1023_v34 = vmul.f32 %v4119_v55, %v2834_v4  ;;  %3419 = vrsqrt.f32 %v916_v23 }
 0x18f   : > { %v1022_v19 = vmul.f32 %v4130_v14, %v2833_v6  ;;  %v1021_v43 = vmul.f32 %v4130_v14, %v2832_v45  ;;  %v2829_v6 = vsel %vm730_vm14, 1.0, %v4909_v48  ;;  %v4165_v45 = vpop.f32.mrf.mxu1 }
 0x191   : > { %1238 = vmatpush1.xpose.msra.mxu0 %v1025_v42  ;;  %v4141_v41 = vpop.eup %3411 }
 0x192   : > { %2879 = vmatprep.subr.msk.mxu0 %vm553_vm1, %v1024_v22  ;;  %v4150_v42 = vpop.eup %3413  ;;  %v1020_v23 = vmul.f32 %v4141_v41, %v2831_v13  ;;  %v2830_v22 = vsel %vm731_vm13, 1.0, %v4909_v48 }
 0x193   : > { %v1018_v13 = vmul.f32 %v4150_v42, %v2829_v6 }
 0x195   : > { %1240 = vmatpush1.xpose.msra.mxu0 %v1023_v34 }
 0x196   : > { %2880 = vmatprep.subr.msk.mxu0 %vm553_vm1, %v1022_v19  ;;  %v1019_v19 = vmul.f32 %v4141_v41, %v2830_v22  ;;  %v4180_v22 = vpop.f32.mrf.mxu1 }
 0x199   : > { %v4154_v4 = vpop.eup %3415  ;;  %1242 = vmatpush1.xpose.msra.mxu0 %v1021_v43 }
 0x19a   : > { %2881 = vmatprep.subr.msk.mxu0 %vm553_vm1, %v1020_v23  ;;  %v948_v34 = vmul.f32 %v4154_v4, %v3986_v40  ;;  %v4170_v12 = vpop.eup %3417  ;;  %v2827_v23 = vsel %vm728_vm2, 1.0, %v4909_v48  ;;  %v1017_v40 = vmul.f32 %v4150_v42, %v2828_v2  ;;  %v947_v8 = vmul.f32 %v4154_v4, %v4005_v28 }
 0x19b   : > { %v1016_v6 = vmul.f32 %v4170_v12, %v2827_v23  ;;  %v2824_v23 = vsel %vm725_vm5, 1.0, %v4909_v48  ;;  %v952_v28 = vmul.f32 %v4170_v12, %v3967_v38 }
 0x19c   : > { %v980_v43 = vmul.f32 %v3759_v57, %v948_v34  ;;  %v2826_v34 = vsel %vm727_vm3, 1.0, %v4909_v48 }
 0x19d   : > { %1244 = vmatpush1.xpose.msra.mxu0 %v1019_v19  ;;  %v4184_v19 = vpop.eup %3419  ;;  %v1015_v2 = vmul.f32 %v4170_v12, %v2826_v34 }
 0x19e   : > { %2882 = vmatprep.subr.msk.mxu0 %vm553_vm1, %v1018_v13  ;;  %2886 = vmatprep.mubr.msk.f32.mxu0 %vm553_vm1, %v980_v43  ;;  %4911 = vst [vmem:[#allocation25_spill] sm:$0xff] %v4184_v19  ;;  %v4193_v13 = vpop.f32.mrf.mxu1  ;;  %v1014_v43 = vmul.f32 %v4184_v19, %v2825_v44  ;;  %v1013_v9 = vmul.f32 %v4184_v19, %v2824_v23  ;;  %v2822_v44 = vsel %vm723_vm6, 1.0, %v4909_v48 }
 0x1a0   : > { %v4200_v26 = vpop.f32.mrf.mxu1 }
 0x1a1   : > { %1246 = vmatpush1.xpose.msra.mxu0 %v1017_v40  ;;  %v2823_v40 = vsel %vm724_vm0, 1.0, %v4909_v48 }
 0x1a2   : > { %2883 = vmatprep.subr.msk.mxu0 %vm553_vm1, %v1016_v6  ;;  %v4204_v6 = vpop.f32.mrf.mxu1  ;;  %v1012_v34 = vmul.f32 %v4154_v4, %v2823_v40  ;;  %v979_v40 = vmul.f32 %v3746_v53, %v947_v8  ;;  %v984_v8 = vmul.f32 %v3759_v57, %v952_v28 }
 0x1a4   : > { %v4208_v46 = vpop.f32.mrf.mxu1 }
 0x1a5   : > { %1248 = vmatpush1.xpose.msra.mxu0 %v1015_v2  ;;  %v1011_v2 = vmul.f32 %v4154_v4, %v2822_v44 }
 0x1a6   : > { %2884 = vmatprep.subr.msk.mxu0 %vm553_vm1, %v1014_v43  ;;  %v950_v43 = vmul.f32 %v4184_v19, %v3812_v16  ;;  %v4216_v23 = vpop.f32.mrf.mxu1 }
 0x1a8   : > { %v4218_v5 = vpop.f32.mrf.mxu1 }
 0x1a9   : > { %1250 = vmatpush1.xpose.msra.mxu0 %v1013_v9  ;;  %v949_v9 = vmul.f32 %v4184_v19, %v3846_v32  ;;  %v954_v32 = vmul.f32 %v4150_v42, %v3783_v3 }
 0x1aa   : > { %2885 = vmatprep.subr.msk.mxu0 %vm553_vm1, %v1012_v34  ;;  %v982_v34 = vmul.f32 %v3759_v57, %v950_v43  ;;  %v3117_v56 = vpop.f32.mrf.mxu1 }
 0x1ab   : > { %v981_v44 = vmul.f32 %v3746_v53, %v949_v9  ;;  %v986_v9 = vmul.f32 %v3759_v57, %v954_v32 }
 0x1ac   : > { %v1538_v16 = vpop.f32.mrf.mxu1 }
 0x1ad   : > { %1252 = vmatpush1.xpose.msra.mxu0 %v1011_v2  ;;  %v951_v2 = vmul.f32 %v4170_v12, %v3991_v27  ;;  %v956_v27 = vmul.f32 %v4141_v41, %v3948_v20 }
 0x1ae   : > { %v3120_v19 = vpop.f32.mrf.mxu1 }
 0x1af   : > { %v983_v43 = vmul.f32 %v3746_v53, %v951_v2  ;;  %v988_v2 = vmul.f32 %v3759_v57, %v956_v27  ;;  %v962_v27 = vmul.f32 %v4108_v35, %v3904_v24 }
 0x1b0   : > { %1286 = vmatmul.mubr.f32.vlgmr.msra.gmra.mxu0 %v979_v40  ;;  %v1548_v38 = vpop.f32.mrf.mxu1  ;;  %v953_v40 = vmul.f32 %v4150_v42, %v3818_v18  ;;  %v958_v18 = vmul.f32 %v4130_v14, %v3744_v52 }
 0x1b1   : > { %2887 = vmatprep.mubr.msk.f32.mxu0 %vm553_vm1, %v982_v34 }
 0x1b2   : > { %v3123_v34 = vpop.f32.mrf.mxu1  ;;  %v985_v28 = vmul.f32 %v3746_v53, %v953_v40  ;;  %v960_v40 = vmul.f32 %v4119_v55, %v3926_v62 }
 0x1b4   : > { %1291 = vmatmul.mubr.f32.gmra.mxu0 %v981_v44  ;;  %v1558_v3 = vpop.f32.mrf.mxu1  ;;  %v955_v44 = vmul.f32 %v4141_v41, %v3972_v7  ;;  %v990_v7 = vmul.f32 %v3759_v57, %v958_v18  ;;  %v4913_v18 = vld [vmem:[#allocation24_spill] sm:$0xff] }
 0x1b5   : > { %2888 = vmatprep.mubr.msk.f32.mxu0 %vm553_vm1, %v984_v8 }
 0x1b6   : > { %v3126_v8 = vpop.f32.mrf.mxu1  ;;  %v987_v32 = vmul.f32 %v3746_v53, %v955_v44 }
 0x1b7   : > { %3127 = vmatprep.subr.mxu1 %v3126_v8 }
 0x1b8   : > { %1296 = vmatmul.mubr.f32.gmra.mxu0 %v983_v43  ;;  %v1568_v20 = vpop.f32.mrf.mxu1  ;;  %3128 = vmatpush3.msra.mxu1 %v3126_v8  ;;  %v957_v43 = vmul.f32 %v4130_v14, %v3765_v59  ;;  %v992_v59 = vmul.f32 %v3759_v57, %v960_v40  ;;  %v1093_v40 = vmul.f32 %v4154_v4, %v4154_v4 }
 0x1b9   : > { %2889 = vmatprep.mubr.msk.f32.mxu0 %vm553_vm1, %v986_v9  ;;  %3129 = vmatprep.subr.mxu1 %v1568_v20  ;;  %v959_v9 = vmul.f32 %v4119_v55, %v3951_v21  ;;  %v994_v21 = vmul.f32 %v3759_v57, %v962_v27 }
 0x1ba   : > { %3130 = vmatpush3.msra.mxu1 %v1568_v20  ;;  %v989_v52 = vmul.f32 %v3746_v53, %v957_v43  ;;  %v4914_v20 = vld [vmem:[#allocation13_spill] sm:$0xff]  ;;  %v4915_v43 = vlaneseq }
 0x1bb   : > { %3131 = vmatprep.subr.mxu1 %v3123_v34  ;;  %v991_v62 = vmul.f32 %v3746_v53, %v959_v9  ;;  %v4916_v9 = vld [vmem:[#allocation16_spill] sm:$0xff] }
 0x1bc   : > { %1301 = vmatmul.mubr.f32.gmra.mxu0 %v985_v28  ;;  %3132 = vmatpush3.msra.mxu1 %v3123_v34  ;;  %v961_v34 = vmul.f32 %v4108_v35, %v3929_v63  ;;  %v964_v28 = vmul.f32 %v4097_v33, %v3882_v10  ;;  %v965_v10 = vmul.f32 %v4086_v37, %v3885_v11 }
 0x1bd   : > { %2890 = vmatprep.mubr.msk.f32.mxu0 %vm553_vm1, %v988_v2  ;;  %3133 = vmatprep.subr.mxu1 %v1558_v3  ;;  %v967_v11 = vmul.f32 %v4075_v39, %v3867_v1  ;;  %v969_v1 = vmul.f32 %v4064_v49, %v3843_v31  ;;  %v971_v31 = vmul.f32 %v4053_v61, %v3815_v17  ;;  %v4912_v2 = vld [vmem:[#allocation14_spill] sm:$0xff] }
 0x1be   : > { %3134 = vmatpush3.msra.mxu1 %v1558_v3  ;;  %v993_v24 = vmul.f32 %v3746_v53, %v961_v34  ;;  %v996_v63 = vmul.f32 %v3759_v57, %v964_v28  ;;  %v966_v3 = vmul.f32 %v4086_v37, %v3864_v0  ;;  %v968_v0 = vmul.f32 %v4075_v39, %v3840_v30 }
 0x1bf   : > { %3135 = vmatprep.subr.mxu1 %v3120_v19  ;;  %v970_v30 = vmul.f32 %v4064_v49, %v3809_v15  ;;  %v972_v15 = vmul.f32 %v4053_v61, %v3768_v60  ;;  %v974_v60 = vmul.f32 %v4042_v47, %v3741_v51  ;;  %v976_v17 = vmul.f32 %v4033_v36, %v3738_v50 }
 0x1c0   : > { %1306 = vmatmul.mubr.f32.gmra.mxu0 %v987_v32  ;;  %3136 = vmatpush3.msra.mxu1 %v3120_v19  ;;  %v963_v19 = vmul.f32 %v4097_v33, %v3907_v25  ;;  %v998_v25 = vmul.f32 %v3759_v57, %v966_v3  ;;  %v978_v8 = vmul.f32 %v4913_v18, %v4912_v2 }
 0x1c1   : > { %2891 = vmatprep.mubr.msk.f32.mxu0 %vm553_vm1, %v990_v7  ;;  %3137 = vmatprep.subr.mxu1 %v1548_v38  ;;  %v1008_v44 = vmul.f32 %v3759_v57, %v976_v17  ;;  %v977_v50 = vmul.f32 %v4913_v18, %v4914_v20  ;;  %v4341_v7 = vand.u32 127, %v4915_v43 }
 0x1c2   : > { %3138 = vmatpush3.msra.mxu1 %v1548_v38  ;;  %v1006_v38 = vmul.f32 %v3759_v57, %v974_v60  ;;  %v1010_v32 = vmul.f32 %v3759_v57, %v978_v8  ;;  %v1098_v60 = vmul.f32 %v4130_v14, %v4130_v14  ;;  %v4923_v14 = vld [vmem:[#allocation20_spill] sm:$0xff] }
 0x1c3   : > { %3139 = vmatprep.subr.mxu1 %v3117_v56  ;;  %vm1045_vm7 = vcmp.eq.s32.totalorder %v3680_v29, %v4341_v7  ;;  %vm1046_vm8 = vcmp.eq.s32.totalorder %v4916_v9, %v4341_v7  ;;  %vm1052_vm13 = vcmp.eq.s32.totalorder %v4923_v14, %v4341_v7  ;;  %v1101_v9 = vmul.f32 %v4097_v33, %v4097_v33  ;;  %v4926_v33 = vld [vmem:[#allocation17_spill] sm:$0xff] }
 0x1c4   : > { %1311 = vmatmul.mubr.f32.gmra.mxu0 %v989_v52  ;;  %3140 = vmatpush3.msra.mxu1 %v3117_v56  ;;  %v995_v56 = vmul.f32 %v3746_v53, %v963_v19  ;;  %v2854_v52 = vsel %vm1045_vm7, 1.0, %v4909_v48  ;;  %vm1055_vm2 = vcmp.eq.s32.totalorder %v4926_v33, %v4341_v7  ;;  %vm1756_vm7 = vcmask 261120  }
 0x1c5   : > { %2892 = vmatprep.mubr.msk.f32.mxu0 %vm553_vm1, %v992_v59  ;;  %3141 = vmatprep.subr.mxu1 %v1538_v16  ;;  %v4917_v59 = vld [vmem:[#allocation25_spill] sm:$0xff] }
 0x1c6   : > { %3142 = vmatpush3.msra.mxu1 %v1538_v16  ;;  %v1000_v16 = vmul.f32 %v3759_v57, %v968_v0  ;;  %v1094_v27 = vmul.f32 %v4917_v59, %v4917_v59  ;;  %v1096_v0 = vmul.f32 %v4150_v42, %v4150_v42  ;;  %v4921_v42 = vld [vmem:[#allocation10_spill] sm:$0xff] }
 0x1c7   : > { %3143 = vmatprep.subr.mxu1 %v4216_v23  ;;  %vm1050_vm11 = vcmp.eq.s32.totalorder %v4921_v42, %v4341_v7 }
 0x1c8   : > { %1316 = vmatmul.mubr.f32.gmra.mxu0 %v991_v62  ;;  %3144 = vmatpush3.msra.mxu1 %v4216_v23  ;;  %v997_v23 = vmul.f32 %v3746_v53, %v965_v10  ;;  %v2855_v62 = vsel %vm1046_vm8, 1.0, %v4909_v48  ;;  %vm3517_vm8 = vmmov 0  }
 0x1c9   : > { %2893 = vmatprep.mubr.msk.f32.mxu0 %vm553_vm1, %v994_v21  ;;  %3145 = vmatprep.subr.mxu1 %v4218_v5  ;;  %v4918_v21 = vld [vmem:[#allocation23_spill] sm:$0xff]  ;;  %v1110_v4 = vmul.f32 %v2855_v62, %v1094_v27 }
 0x1ca   : > { %3146 = vmatpush3.msra.mxu1 %v4218_v5  ;;  %v999_v5 = vmul.f32 %v3746_v53, %v967_v11 }
 0x1cb   : > { %3147 = vmatprep.subr.mxu1 %v4204_v6 }
 0x1cc   : > { %1321 = vmatmul.mubr.f32.gmra.mxu0 %v993_v24  ;;  %3148 = vmatpush3.msra.mxu1 %v4204_v6  ;;  %v1002_v6 = vmul.f32 %v3759_v57, %v970_v30  ;;  %v1095_v24 = vmul.f32 %v4170_v12, %v4170_v12  ;;  %v4920_v12 = vld [vmem:[#allocation22_spill] sm:$0xff] }
 0x1cd   : > { %2894 = vmatprep.mubr.msk.f32.mxu0 %vm553_vm1, %v996_v63  ;;  %3149 = vmatprep.subr.mxu1 %v4208_v46  ;;  %vm1049_vm10 = vcmp.eq.s32.totalorder %v4920_v12, %v4341_v7 }
 0x1ce   : > { %3150 = vmatpush3.msra.mxu1 %v4208_v46  ;;  %v1001_v46 = vmul.f32 %v3746_v53, %v969_v1  ;;  %v1097_v1 = vmul.f32 %v4141_v41, %v4141_v41  ;;  %v4922_v41 = vld [vmem:[#allocation21_spill] sm:$0xff] }
 0x1cf   : > { %3151 = vmatprep.subr.mxu1 %v4193_v13  ;;  %vm1051_vm12 = vcmp.eq.s32.totalorder %v4922_v41, %v4341_v7 }
 0x1d0   : > { %1326 = vmatmul.mubr.f32.gmra.mxu0 %v995_v56  ;;  %3152 = vmatpush3.msra.mxu1 %v4193_v13  ;;  %v1004_v13 = vmul.f32 %v3759_v57, %v972_v15  ;;  %v1109_v57 = vmul.f32 %v2854_v52, %v1093_v40  ;;  %v4919_v56 = vld [vmem:[#allocation12_spill] sm:$0xff]  ;;  %v2858_v15 = vsel %vm1049_vm10, 1.0, %v4909_v48  ;;  %v2860_v2 = vsel %vm1051_vm12, 1.0, %v4909_v48 }
 0x1d1   : > { %2895 = vmatprep.mubr.msk.f32.mxu0 %vm553_vm1, %v998_v25  ;;  %3153 = vmatprep.subr.mxu1 %v4200_v26  ;;  %vm1048_vm9 = vcmp.eq.s32.totalorder %v4919_v56, %v4341_v7 }
 0x1d2   : > { %3154 = vmatpush3.msra.mxu1 %v4200_v26  ;;  %v1003_v26 = vmul.f32 %v3746_v53, %v971_v31  ;;  %v2857_v11 = vsel %vm1048_vm9, 1.0, %v4909_v48 }
 0x1d3   : > { %3155 = vmatprep.subr.mxu1 %v4165_v45 }
 0x1d4   : > { %1331 = vmatmul.mubr.f32.gmra.mxu0 %v997_v23  ;;  %3156 = vmatpush3.msra.mxu1 %v4165_v45  ;;  %v973_v45 = vmul.f32 %v4042_v47, %v3762_v58 }
 0x1d5   : > { %2896 = vmatprep.mubr.msk.f32.mxu0 %vm553_vm1, %v1000_v16  ;;  %3157 = vmatprep.subr.mxu1 %v4180_v22 }
 0x1d6   : > { %3158 = vmatpush3.msra.mxu1 %v4180_v22  ;;  %v1005_v51 = vmul.f32 %v3746_v53, %v973_v45  ;;  %v975_v22 = vmul.f32 %v4033_v36, %v3749_v54  ;;  %v1009_v54 = vmul.f32 %v3746_v53, %v977_v50  ;;  %v2859_v45 = vsel %vm1050_vm11, 1.0, %v4909_v48 }
 0x1d7   : > { %v1100_v50 = vmul.f32 %v4108_v35, %v4108_v35  ;;  %v4925_v35 = vld [vmem:[#allocation18_spill] sm:$0xff] }
 0x1d8   : > { %1336 = vmatmul.mubr.f32.gmra.mxu0 %v999_v5  ;;  %v1007_v58 = vmul.f32 %v3746_v53, %v975_v22  ;;  %v1112_v5 = vmul.f32 %v2857_v11, %v1096_v0  ;;  %v1099_v22 = vmul.f32 %v4119_v55, %v4119_v55  ;;  %v4924_v55 = vld [vmem:[#allocation19_spill] sm:$0xff]  ;;  %vm1054_vm15 = vcmp.eq.s32.totalorder %v4925_v35, %v4341_v7 }
 0x1d9   : > { %2897 = vmatprep.mubr.msk.f32.mxu0 %vm553_vm1, %v1002_v6  ;;  %vm1053_vm14 = vcmp.eq.s32.totalorder %v4924_v55, %v4341_v7  ;;  %v1104_v11 = vmul.f32 %v4064_v49, %v4064_v49  ;;  %v4929_v49 = vld [vmem:[#allocation9_spill] sm:$0xff] }
 0x1da   : > { %v1115_v20 = vmul.f32 %v2860_v2, %v1099_v22  ;;  %v2862_v59 = vsel %vm1053_vm14, 1.0, %v4909_v48  ;;  %vm1058_vm5 = vcmp.eq.s32.totalorder %v4929_v49, %v4341_v7  ;;  %v1107_v2 = vmul.f32 %v4033_v36, %v4033_v36 }
 0x1db   : > { %v1117_v62 = vmul.f32 %v2862_v59, %v1101_v9 }
 0x1dc   : > { %1341 = vmatmul.mubr.f32.gmra.mxu0 %v1001_v46 }
 0x1dd   : > { %2898 = vmatprep.mubr.msk.f32.mxu0 %vm553_vm1, %v1004_v13  ;;  %v1113_v13 = vmul.f32 %v2858_v15, %v1097_v1  ;;  %v1105_v15 = vmul.f32 %v4053_v61, %v4053_v61  ;;  %v4930_v61 = vld [vmem:[#allocation8_spill] sm:$0xff] }
 0x1de   : > { %vm1059_vm0 = vcmp.eq.s32.totalorder %v4930_v61, %v4341_v7 }
 0x1e0   : > { %1346 = vmatmul.mubr.f32.gmra.mxu0 %v1003_v26 }
 0x1e1   : > { %2899 = vmatprep.mubr.msk.f32.mxu0 %vm553_vm1, %v1006_v38 }
 0x1e4   : > { %1351 = vmatmul.mubr.f32.gmra.mxu0 %v1005_v51  ;;  %v1114_v51 = vmul.f32 %v2859_v45, %v1098_v60  ;;  %v1106_v45 = vmul.f32 %v4042_v47, %v4042_v47  ;;  %v4931_v47 = vld [vmem:[#allocation7_spill] sm:$0xff] }
 0x1e5   : > { %2900 = vmatprep.mubr.msk.f32.mxu0 %vm553_vm1, %v1008_v44  ;;  %vm1060_vm6 = vcmp.eq.s32.totalorder %v4931_v47, %v4341_v7 }
 0x1e8   : > { %1356 = vmatmul.mubr.f32.gmra.mxu0 %v1007_v58 }
 0x1e9   : > { %2901 = vmatprep.mubr.msk.f32.mxu0 %vm553_vm1, %v1010_v32  ;;  %vm1047_vm1 = vcmp.eq.s32.totalorder %v4918_v21, %v4341_v7 }
 0x1ea   : > { %v2856_v63 = vsel %vm1047_vm1, 1.0, %v4909_v48 }
 0x1eb   : > { %v1111_v25 = vmul.f32 %v2856_v63, %v1095_v24  ;;  %v1103_v63 = vmul.f32 %v4075_v39, %v4075_v39  ;;  %v4928_v39 = vld [vmem:[#allocation11_spill] sm:$0xff] }
 0x1ec   : > { %1361 = vmatmul.mubr.f32.gmra.mxu0 %v1009_v54  ;;  %v2861_v54 = vsel %vm1052_vm13, 1.0, %v4909_v48  ;;  %vm1057_vm4 = vcmp.eq.s32.totalorder %v4928_v39, %v4341_v7 }
 0x1ed   : > { %v1116_v52 = vmul.f32 %v2861_v54, %v1100_v50  ;;  %v1108_v54 = vmul.f32 %v4913_v18, %v4913_v18  ;;  %v1747_v18 = vld [vmem:[%s4848_s7 + $0x10] sm:$0xff] }
 0x270   : > { %v1287_v53 = vpop.f32.mrf.mxu0 }
 0x271   : > { %v1288_v34 = vadd.f32 %v1287_v53, %v1109_v57 }
 0x272   : > { %v1289_v28 = vpop.f32.mrf.mxu0 }
 0x273   : > { %3159 = vmatprep.mubr.f32.mxu1 %v1288_v34  ;;  %3279 = vmatprep.mubr.f32.mxu0 %v1288_v34  ;;  %v1102_v34 = vmul.f32 %v4086_v37, %v4086_v37  ;;  %v2863_v28 = vsel %vm1054_vm15, 1.0, %v4909_v48  ;;  %v4927_v37 = vld [vmem:[#allocation15_spill] sm:$0xff] }
 0x274   : > { %v1292_v19 = vpop.f32.mrf.mxu0  ;;  %vm1056_vm3 = vcmp.eq.s32.totalorder %v4927_v37, %v4341_v7 }
 0x275   : > { %v4358_v3 = vadd.f32 %v1292_v19, %v1110_v4  ;;  %v1118_v19 = vmul.f32 %v2863_v28, %v1102_v34  ;;  %v1745_v34 = vld [vmem:[%s4848_s7] sm:$0xff] }
 0x276   : > { %v1294_v10 = vpop.f32.mrf.mxu0 }
 0x277   : > { %3160 = vmatmul.mubr.f32.vlgmr.msra.gmra.mxu1 %v4358_v3  ;;  %v2864_v10 = vsel %vm1055_vm2, 1.0, %v4909_v48 }
 0x278   : > { %v1297_v23 = vpop.f32.mrf.mxu0 }
 0x279   : > { %v4366_v16 = vadd.f32 %v1297_v23, %v1111_v25  ;;  %v1119_v23 = vmul.f32 %v2864_v10, %v1103_v63 }
 0x27a   : > { %v1299_v30 = vpop.f32.mrf.mxu0 }
 0x27b   : > { %3162 = vmatprep.mubr.f32.mxu1 %v4366_v16  ;;  %v2865_v30 = vsel %vm1056_vm3, 1.0, %v4909_v48 }
 0x27c   : > { %v1302_v6 = vpop.f32.mrf.mxu0 }
 0x27d   : > { %v4374_v46 = vadd.f32 %v1302_v6, %v1112_v5  ;;  %v1120_v6 = vmul.f32 %v2865_v30, %v1104_v11 }
 0x27e   : > { %v1304_v31 = vpop.f32.mrf.mxu0 }
 0x27f   : > { %3163 = vmatmul.mubr.f32.gmra.mxu1 %v4374_v46  ;;  %v2866_v31 = vsel %vm1057_vm4, 1.0, %v4909_v48 }
 0x280   : > { %v1307_v26 = vpop.f32.mrf.mxu0 }
 0x281   : > { %v4382_v38 = vadd.f32 %v1307_v26, %v1113_v13  ;;  %v1121_v26 = vmul.f32 %v2866_v31, %v1105_v15 }
 0x282   : > { %v1309_v17 = vpop.f32.mrf.mxu0 }
 0x283   : > { %3165 = vmatprep.mubr.f32.mxu1 %v4382_v38  ;;  %v2867_v17 = vsel %vm1058_vm5, 1.0, %v4909_v48 }
 0x284   : > { %v1312_v44 = vpop.f32.mrf.mxu0 }
 0x285   : > { %v4390_v8 = vadd.f32 %v1312_v44, %v1114_v51  ;;  %v1122_v44 = vmul.f32 %v2867_v17, %v1106_v45 }
 0x286   : > { %v1314_v58 = vpop.f32.mrf.mxu0 }
 0x287   : > { %3166 = vmatmul.mubr.f32.gmra.mxu1 %v4390_v8  ;;  %v2868_v58 = vsel %vm1059_vm0, 1.0, %v4909_v48 }
 0x288   : > { %v1317_v32 = vpop.f32.mrf.mxu0 }
 0x289   : > { %v4398_v43 = vadd.f32 %v1317_v32, %v1115_v20  ;;  %v1123_v32 = vmul.f32 %v2868_v58, %v1107_v2 }
 0x28a   : > { %v1319_v40 = vpop.f32.mrf.mxu0 }
 0x28b   : > { %3168 = vmatprep.mubr.f32.mxu1 %v4398_v43  ;;  %v2869_v40 = vsel %vm1060_vm6, 1.0, %v4909_v48 }
 0x28c   : > { %v1322_v57 = vpop.f32.mrf.mxu0  ;;  %v1124_v9 = vmul.f32 %v2869_v40, %v1108_v54 }
 0x28d   : > { %v4406_v27 = vadd.f32 %v1322_v57, %v1116_v52 }
 0x28e   : > { %v1324_v53 = vpop.f32.mrf.mxu0 }
 0x28f   : > { %3169 = vmatmul.mubr.f32.gmra.mxu1 %v4406_v27  ;;  %v1748_v53 = vld [vmem:[%s4848_s7 + $0x18] sm:$0xff] }
 0x290   : > { %v1327_v21 = vpop.f32.mrf.mxu0  ;;  %3183 = vmatprep.subr.mxu1 %v1748_v53 }
 0x291   : > { %v4414_v4 = vadd.f32 %v1327_v21, %v1117_v62  ;;  %3184 = vmatpush3.msra.mxu1 %v1748_v53  ;;  %v1746_v62 = vld [vmem:[%s4848_s7 + $0x8] sm:$0xff]  ;;  %v2918_v21 = vld [vmem:[%s4847_s6] ss:$0 sm:$0xff] }
 0x292   : > { %v1329_v24 = vpop.f32.mrf.mxu0  ;;  %3185 = vmatprep.subr.mxu1 %v1747_v18 }
 0x293   : > { %3171 = vmatprep.mubr.f32.mxu1 %v4414_v4  ;;  %3186 = vmatpush3.msra.mxu1 %v1747_v18 }
 0x294   : > { %v1332_v56 = vpop.f32.mrf.mxu0  ;;  %3187 = vmatprep.subr.mxu1 %v1746_v62 }
 0x295   : > { %v4422_v25 = vadd.f32 %v1332_v56, %v1118_v19  ;;  %3188 = vmatpush3.msra.mxu1 %v1746_v62 }
 0x296   : > { %v1334_v0 = vpop.f32.mrf.mxu0  ;;  %3189 = vmatprep.subr.mxu1 %v1745_v34 }
 0x297   : > { %3172 = vmatmul.mubr.f32.gmra.mxu1 %v4422_v25 }
 0x298   : > { %v1337_v12 = vpop.f32.mrf.mxu0  ;;  %3190 = vmatpush3.msra.mxu1 %v1745_v34 }
 0x299   : > { %v4430_v5 = vadd.f32 %v1337_v12, %v1119_v23 }
 0x29a   : > { %v1339_v1 = vpop.f32.mrf.mxu0 }
 0x29b   : > { %3174 = vmatprep.mubr.f32.mxu1 %v4430_v5 }
 0x29c   : > { %v1342_v42 = vpop.f32.mrf.mxu0 }
 0x29d   : > { %v4438_v13 = vadd.f32 %v1342_v42, %v1120_v6 }
 0x29e   : > { %v1344_v60 = vpop.f32.mrf.mxu0 }
 0x29f   : > { %3175 = vmatmul.mubr.f32.gmra.mxu1 %v4438_v13 }
 0x2a0   : > { %v1347_v41 = vpop.f32.mrf.mxu0 }
 0x2a1   : > { %v4446_v51 = vadd.f32 %v1347_v41, %v1121_v26 }
 0x2a2   : > { %v1349_v22 = vpop.f32.mrf.mxu0 }
 0x2a3   : > { %3177 = vmatprep.mubr.f32.mxu1 %v4446_v51 }
 0x2a4   : > { %v1352_v14 = vpop.f32.mrf.mxu0 }
 0x2a5   : > { %v4454_v20 = vadd.f32 %v1352_v14, %v1122_v44 }
 0x2a6   : > { %v1354_v50 = vpop.f32.mrf.mxu0 }
 0x2a7   : > { %3178 = vmatmul.mubr.f32.gmra.mxu1 %v4454_v20 }
 0x2a8   : > { %v1357_v55 = vpop.f32.mrf.mxu0 }
 0x2a9   : > { %v4462_v52 = vadd.f32 %v1357_v55, %v1123_v32 }
 0x2aa   : > { %v1359_v36 = vpop.f32.mrf.mxu0 }
 0x2ab   : > { %3180 = vmatprep.mubr.f32.mxu1 %v4462_v52 }
 0x2ac   : > { %v1362_v57 = vpop.f32.mrf.mxu0 }
 0x2ad   : > { %v4465_v59 = vadd.f32 %v1362_v57, %v1124_v9 }
 0x2ae   : > { %v1364_v35 = vpop.f32.mrf.mxu0 }
 0x2af   : > { %3181 = vmatmul.mubr.f32.gmra.mxu1 %v4465_v59 }
 0x337   : > { %v3161_v28 = vpop.f32.mrf.mxu1 }
 0x338   : > { %v1656_v33 = vadd.f32 %v3161_v28, %v2918_v21 }
 0x339   : > { %v1650_v24 = vpop.f32.mrf.mxu1 }
 0x33a   : > { %v1651_v19 = vadd.f32 %v2918_v21, %v1650_v24  ;;  %v1730_v56 = vmax.f32 %v1656_v33, 0.0 }
 0x33c   : > { %v1729_v63 = vmax.f32 %v1651_v19, 0.0  ;;  %v2919_v19 = vld [vmem:[%s4849_s8] ss:$0 sm:$0xff] }
 0x33e   : > { %3191 = vmatprep.mubr.msk.f32.mxu1 %vm1756_vm7, %v1729_v63 }
 0x33f   : > { %v3164_v10 = vpop.f32.mrf.mxu1  ;;  %3192 = vmatmul.mubr.msk.f32.vlgmr.msra.gmra.mxu1 %vm1756_vm7, %v1730_v56 }
 0x340   : > { %v1666_v37 = vadd.f32 %v3164_v10, %v2918_v21 }
 0x341   : > { %v1660_v0 = vpop.f32.mrf.mxu1 }
 0x342   : > { %v1661_v23 = vadd.f32 %v2918_v21, %v1660_v0  ;;  %v1732_v12 = vmax.f32 %v1666_v37, 0.0 }
 0x344   : > { %v1731_v11 = vmax.f32 %v1661_v23, 0.0 }
 0x346   : > { %3194 = vmatprep.mubr.msk.f32.mxu1 %vm1756_vm7, %v1731_v11 }
 0x347   : > { %v3167_v30 = vpop.f32.mrf.mxu1  ;;  %3195 = vmatmul.mubr.msk.f32.gmra.mxu1 %vm1756_vm7, %v1732_v12 }
 0x348   : > { %v1676_v39 = vadd.f32 %v3167_v30, %v2918_v21 }
 0x349   : > { %v1670_v1 = vpop.f32.mrf.mxu1 }
 0x34a   : > { %v1671_v6 = vadd.f32 %v2918_v21, %v1670_v1  ;;  %v1734_v42 = vmax.f32 %v1676_v39, 0.0 }
 0x34c   : > { %v1733_v15 = vmax.f32 %v1671_v6, 0.0 }
 0x34e   : > { %3197 = vmatprep.mubr.msk.f32.mxu1 %vm1756_vm7, %v1733_v15 }
 0x34f   : > { %v3170_v31 = vpop.f32.mrf.mxu1  ;;  %3198 = vmatmul.mubr.msk.f32.gmra.mxu1 %vm1756_vm7, %v1734_v42 }
 0x350   : > { %v1686_v49 = vadd.f32 %v3170_v31, %v2918_v21 }
 0x351   : > { %v1680_v60 = vpop.f32.mrf.mxu1 }
 0x352   : > { %v1681_v26 = vadd.f32 %v2918_v21, %v1680_v60  ;;  %v1736_v41 = vmax.f32 %v1686_v49, 0.0 }
 0x354   : > { %v1735_v45 = vmax.f32 %v1681_v26, 0.0 }
 0x356   : > { %3200 = vmatprep.mubr.msk.f32.mxu1 %vm1756_vm7, %v1735_v45 }
 0x357   : > { %v3173_v17 = vpop.f32.mrf.mxu1  ;;  %3201 = vmatmul.mubr.msk.f32.gmra.mxu1 %vm1756_vm7, %v1736_v41 }
 0x358   : > { %v1696_v61 = vadd.f32 %v3173_v17, %v2918_v21 }
 0x359   : > { %v1690_v22 = vpop.f32.mrf.mxu1 }
 0x35a   : > { %v1691_v44 = vadd.f32 %v2918_v21, %v1690_v22  ;;  %v1738_v14 = vmax.f32 %v1696_v61, 0.0 }
 0x35c   : > { %v1737_v2 = vmax.f32 %v1691_v44, 0.0 }
 0x35e   : > { %3203 = vmatprep.mubr.msk.f32.mxu1 %vm1756_vm7, %v1737_v2 }
 0x35f   : > { %v3176_v58 = vpop.f32.mrf.mxu1  ;;  %3204 = vmatmul.mubr.msk.f32.gmra.mxu1 %vm1756_vm7, %v1738_v14 }
 0x360   : > { %v1706_v47 = vadd.f32 %v3176_v58, %v2918_v21 }
 0x361   : > { %v1700_v50 = vpop.f32.mrf.mxu1 }
 0x362   : > { %v1701_v32 = vadd.f32 %v2918_v21, %v1700_v50  ;;  %v1740_v55 = vmax.f32 %v1706_v47, 0.0 }
 0x364   : > { %v1739_v54 = vmax.f32 %v1701_v32, 0.0 }
 0x366   : > { %3206 = vmatprep.mubr.msk.f32.mxu1 %vm1756_vm7, %v1739_v54 }
 0x367   : > { %v3179_v40 = vpop.f32.mrf.mxu1  ;;  %3207 = vmatmul.mubr.msk.f32.gmra.mxu1 %vm1756_vm7, %v1740_v55 }
 0x368   : > { %v1716_v36 = vadd.f32 %v3179_v40, %v2918_v21 }
 0x369   : > { %v1710_v9 = vpop.f32.mrf.mxu1 }
 0x36a   : > { %v1711_v57 = vadd.f32 %v2918_v21, %v1710_v9  ;;  %v1742_v53 = vmax.f32 %v1716_v36, 0.0 }
 0x36c   : > { %v1741_v35 = vmax.f32 %v1711_v57, 0.0 }
 0x36e   : > { %3209 = vmatprep.mubr.msk.f32.mxu1 %vm1756_vm7, %v1741_v35 }
 0x36f   : > { %v3182_v18 = vpop.f32.mrf.mxu1  ;;  %3210 = vmatmul.mubr.msk.f32.gmra.mxu1 %vm1756_vm7, %v1742_v53 }
 0x370   : > { %v1726_v62 = vadd.f32 %v3182_v18, %v2918_v21 }
 0x371   : > { %v1720_v34 = vpop.f32.mrf.mxu1 }
 0x372   : > { %v1721_v28 = vadd.f32 %v2918_v21, %v1720_v34  ;;  %v1744_v24 = vmax.f32 %v1726_v62, 0.0 }
 0x374   : > { %v1743_v33 = vmax.f32 %v1721_v28, 0.0 }
 0x376   : > { %3212 = vmatprep.mubr.msk.f32.mxu1 %vm1756_vm7, %v1743_v33 }
 0x377   : > { %3213 = vmatmul.mubr.msk.f32.gmra.mxu1 %vm1756_vm7, %v1744_v24 }
 0x3ff   : > { %v3193_v63 = vpop.f32.mrf.mxu1 }
 0x400   : > { %v4502_v56 = vadd.f32 %v3193_v63, %v2919_v19 }
 0x401   : > { %v1871_v10 = vpop.f32.mrf.mxu1 }
 0x402   : > { %v4504_v37 = vadd.f32 %v2919_v19, %v1871_v10  ;;  %v1953_v0 = vsel %vm1756_vm7, %v4502_v56, 0.0 }
 0x403   : > { %1954 = vadd.xlane.f32.xlu1 %v1953_v0 }
 0x404   : > { %v1950_v21 = vsel %vm1756_vm7, %v4504_v37, 0.0 }
 0x405   : > { %1951 = vadd.xlane.f32.xlu0 %v1950_v21 }
 0x407   : > { %v3196_v23 = vpop.f32.mrf.mxu1 }
 0x408   : > { %v4510_v11 = vadd.f32 %v3196_v23, %v2919_v19 }
 0x409   : > { %v1881_v12 = vpop.f32.mrf.mxu1 }
 0x40a   : > { %v4512_v30 = vadd.f32 %v2919_v19, %v1881_v12  ;;  %v1959_v39 = vsel %vm1756_vm7, %v4510_v11, 0.0 }
 0x40b   : > { %1960 = vadd.xlane.f32.xlu1 %v1959_v39 }
 0x40c   : > { %v1956_v1 = vsel %vm1756_vm7, %v4512_v30, 0.0 }
 0x40d   : > { %1957 = vadd.xlane.f32.xlu0 %v1956_v1 }
 0x40f   : > { %v3199_v6 = vpop.f32.mrf.mxu1 }
 0x410   : > { %v4518_v15 = vadd.f32 %v3199_v6, %v2919_v19 }
 0x411   : > { %v1891_v42 = vpop.f32.mrf.mxu1 }
 0x412   : > { %v4520_v31 = vadd.f32 %v2919_v19, %v1891_v42  ;;  %v1965_v49 = vsel %vm1756_vm7, %v4518_v15, 0.0 }
 0x413   : > { %1966 = vadd.xlane.f32.xlu1 %v1965_v49 }
 0x414   : > { %v1962_v60 = vsel %vm1756_vm7, %v4520_v31, 0.0 }
 0x415   : > { %1963 = vadd.xlane.f32.xlu0 %v1962_v60 }
 0x417   : > { %v3202_v26 = vpop.f32.mrf.mxu1 }
 0x418   : > { %v4526_v45 = vadd.f32 %v3202_v26, %v2919_v19 }
 0x419   : > { %v1901_v41 = vpop.f32.mrf.mxu1 }
 0x41a   : > { %v4528_v17 = vadd.f32 %v2919_v19, %v1901_v41  ;;  %v1971_v61 = vsel %vm1756_vm7, %v4526_v45, 0.0 }
 0x41b   : > { %1972 = vadd.xlane.f32.xlu1 %v1971_v61 }
 0x41c   : > { %v1968_v22 = vsel %vm1756_vm7, %v4528_v17, 0.0 }
 0x41d   : > { %1969 = vadd.xlane.f32.xlu0 %v1968_v22 }
 0x41f   : > { %v3205_v44 = vpop.f32.mrf.mxu1 }
 0x420   : > { %v4534_v2 = vadd.f32 %v3205_v44, %v2919_v19 }
 0x421   : > { %v1911_v14 = vpop.f32.mrf.mxu1 }
 0x422   : > { %v4536_v58 = vadd.f32 %v2919_v19, %v1911_v14  ;;  %v1977_v47 = vsel %vm1756_vm7, %v4534_v2, 0.0 }
 0x423   : > { %1978 = vadd.xlane.f32.xlu1 %v1977_v47 }
 0x424   : > { %v1974_v50 = vsel %vm1756_vm7, %v4536_v58, 0.0 }
 0x425   : > { %1975 = vadd.xlane.f32.xlu0 %v1974_v50 }
 0x427   : > { %v3208_v32 = vpop.f32.mrf.mxu1 }
 0x428   : > { %v4542_v54 = vadd.f32 %v3208_v32, %v2919_v19 }
 0x429   : > { %v1921_v55 = vpop.f32.mrf.mxu1 }
 0x42a   : > { %v4544_v40 = vadd.f32 %v2919_v19, %v1921_v55  ;;  %v1983_v36 = vsel %vm1756_vm7, %v4542_v54, 0.0 }
 0x42b   : > { %1984 = vadd.xlane.f32.xlu1 %v1983_v36 }
 0x42c   : > { %v1980_v9 = vsel %vm1756_vm7, %v4544_v40, 0.0 }
 0x42d   : > { %1981 = vadd.xlane.f32.xlu0 %v1980_v9 }
 0x42f   : > { %v3211_v57 = vpop.f32.mrf.mxu1 }
 0x430   : > { %v4550_v35 = vadd.f32 %v3211_v57, %v2919_v19 }
 0x431   : > { %v1931_v53 = vpop.f32.mrf.mxu1 }
 0x432   : > { %v4552_v18 = vadd.f32 %v2919_v19, %v1931_v53  ;;  %v1989_v62 = vsel %vm1756_vm7, %v4550_v35, 0.0 }
 0x433   : > { %1990 = vadd.xlane.f32.xlu1 %v1989_v62 }
 0x434   : > { %v1986_v34 = vsel %vm1756_vm7, %v4552_v18, 0.0 }
 0x435   : > { %1987 = vadd.xlane.f32.xlu0 %v1986_v34 }
 0x437   : > { %v3214_v28 = vpop.f32.mrf.mxu1 }
 0x438   : > { %v4558_v33 = vadd.f32 %v3214_v28, %v2919_v19 }
 0x439   : > { %v1941_v24 = vpop.f32.mrf.mxu1 }
 0x43a   : > { %v4560_v63 = vadd.f32 %v2919_v19, %v1941_v24  ;;  %v1995_v10 = vsel %vm1756_vm7, %v4558_v33, 0.0 }
 0x43b   : > { %1996 = vadd.xlane.f32.xlu1 %v1995_v10 }
 0x43c   : > { %v1992_v0 = vsel %vm1756_vm7, %v4560_v63, 0.0 }
 0x43d   : > { %1993 = vadd.xlane.f32.xlu0 %v1992_v0 }
 0x48c   : > { %v1955_v21 = vpop.xlane.xlu1 %1954 }
 0x48d   : > { %v2000_v23 = vmul.f32 0.03125, %v1955_v21 }
 0x48e   : > { %v1952_v12 = vpop.xlane.xlu0 %1951 }
 0x48f   : > { %v4567_v39 = vsub.f32 %v4502_v56, %v2000_v23  ;;  %v1999_v1 = vmul.f32 0.03125, %v1952_v12 }
 0x491   : > { %v4570_v6 = vsub.f32 %v4504_v37, %v1999_v1  ;;  %v2032_v19 = vmul.f32 %v4567_v39, %v4567_v39 }
 0x493   : > { %v2050_v42 = vsel %vm1756_vm7, %v2032_v19, 0.0  ;;  %v2031_v49 = vmul.f32 %v4570_v6, %v4570_v6 }
 0x494   : > { %v1961_v60 = vpop.xlane.xlu1 %1960  ;;  %2051 = vadd.xlane.f32.xlu1 %v2050_v42 }
 0x495   : > { %v2002_v26 = vmul.f32 0.03125, %v1961_v60  ;;  %v2047_v41 = vsel %vm1756_vm7, %v2031_v49, 0.0 }
 0x496   : > { %2048 = vadd.xlane.f32.xlu0 %v2047_v41  ;;  %v1958_v56 = vpop.xlane.xlu0 %1957 }
 0x497   : > { %v4579_v61 = vsub.f32 %v4510_v11, %v2002_v26  ;;  %v2001_v37 = vmul.f32 0.03125, %v1958_v56 }
 0x499   : > { %v4582_v22 = vsub.f32 %v4512_v30, %v2001_v37  ;;  %v2034_v44 = vmul.f32 %v4579_v61, %v4579_v61 }
 0x49b   : > { %v2056_v14 = vsel %vm1756_vm7, %v2034_v44, 0.0  ;;  %v2033_v47 = vmul.f32 %v4582_v22, %v4582_v22  ;;  %v2224_v44 = vld [vmem:[%s4852_s11 + $0x18] sm:$0xff] }
 0x49c   : > { %v1967_v50 = vpop.xlane.xlu1 %1966  ;;  %2057 = vadd.xlane.f32.xlu1 %v2056_v14  ;;  %3215 = vmatprep.subr.mxu1 %v2224_v44 }
 0x49d   : > { %v2004_v32 = vmul.f32 0.03125, %v1967_v50  ;;  %v2053_v55 = vsel %vm1756_vm7, %v2033_v47, 0.0  ;;  %3216 = vmatpush3.msra.mxu1 %v2224_v44 }
 0x49e   : > { %2054 = vadd.xlane.f32.xlu0 %v2053_v55  ;;  %v1964_v11 = vpop.xlane.xlu0 %1963 }
 0x49f   : > { %v4591_v36 = vsub.f32 %v4518_v15, %v2004_v32  ;;  %v2003_v30 = vmul.f32 0.03125, %v1964_v11 }
 0x4a1   : > { %v4594_v9 = vsub.f32 %v4520_v31, %v2003_v30  ;;  %v2036_v57 = vmul.f32 %v4591_v36, %v4591_v36  ;;  %v2222_v30 = vld [vmem:[%s4852_s11 + $0x8] sm:$0xff] }
 0x4a3   : > { %v2062_v53 = vsel %vm1756_vm7, %v2036_v57, 0.0  ;;  %v2035_v62 = vmul.f32 %v4594_v9, %v4594_v9 }
 0x4a4   : > { %v1973_v34 = vpop.xlane.xlu1 %1972  ;;  %2063 = vadd.xlane.f32.xlu1 %v2062_v53 }
 0x4a5   : > { %v2006_v28 = vmul.f32 0.03125, %v1973_v34  ;;  %v2059_v24 = vsel %vm1756_vm7, %v2035_v62, 0.0 }
 0x4a6   : > { %2060 = vadd.xlane.f32.xlu0 %v2059_v24  ;;  %v1970_v15 = vpop.xlane.xlu0 %1969 }
 0x4a7   : > { %v4603_v10 = vsub.f32 %v4526_v45, %v2006_v28  ;;  %v2005_v31 = vmul.f32 0.03125, %v1970_v15 }
 0x4a9   : > { %v4606_v0 = vsub.f32 %v4528_v17, %v2005_v31  ;;  %v2038_v21 = vmul.f32 %v4603_v10, %v4603_v10 }
 0x4ab   : > { %v2068_v23 = vsel %vm1756_vm7, %v2038_v21, 0.0  ;;  %v2037_v12 = vmul.f32 %v4606_v0, %v4606_v0 }
 0x4ac   : > { %v1979_v1 = vpop.xlane.xlu1 %1978  ;;  %2069 = vadd.xlane.f32.xlu1 %v2068_v23 }
 0x4ad   : > { %v2008_v19 = vmul.f32 0.03125, %v1979_v1  ;;  %v2065_v42 = vsel %vm1756_vm7, %v2037_v12, 0.0 }
 0x4ae   : > { %2066 = vadd.xlane.f32.xlu0 %v2065_v42  ;;  %v1976_v45 = vpop.xlane.xlu0 %1975 }
 0x4af   : > { %v4615_v49 = vsub.f32 %v4534_v2, %v2008_v19  ;;  %v2007_v17 = vmul.f32 0.03125, %v1976_v45  ;;  %v2223_v2 = vld [vmem:[%s4852_s11 + $0x10] sm:$0xff] }
 0x4b0   : > { %3217 = vmatprep.subr.mxu1 %v2223_v2 }
 0x4b1   : > { %v4618_v60 = vsub.f32 %v4536_v58, %v2007_v17  ;;  %v2040_v26 = vmul.f32 %v4615_v49, %v4615_v49  ;;  %3218 = vmatpush3.msra.mxu1 %v2223_v2 }
 0x4b2   : > { %3219 = vmatprep.subr.mxu1 %v2222_v30 }
 0x4b3   : > { %v2074_v41 = vsel %vm1756_vm7, %v2040_v26, 0.0  ;;  %v2039_v56 = vmul.f32 %v4618_v60, %v4618_v60  ;;  %3220 = vmatpush3.msra.mxu1 %v2222_v30 }
 0x4b4   : > { %v1985_v37 = vpop.xlane.xlu1 %1984  ;;  %2075 = vadd.xlane.f32.xlu1 %v2074_v41 }
 0x4b5   : > { %v2010_v58 = vmul.f32 0.03125, %v1985_v37  ;;  %v2071_v14 = vsel %vm1756_vm7, %v2039_v56, 0.0 }
 0x4b6   : > { %2072 = vadd.xlane.f32.xlu0 %v2071_v14  ;;  %v1982_v47 = vpop.xlane.xlu0 %1981 }
 0x4b7   : > { %v4633_v50 = vsub.f32 %v4542_v54, %v2010_v58  ;;  %v2009_v32 = vmul.f32 0.03125, %v1982_v47 }
 0x4b9   : > { %v4636_v55 = vsub.f32 %v4544_v40, %v2009_v32  ;;  %v2042_v11 = vmul.f32 %v4633_v50, %v4633_v50  ;;  %v2221_v40 = vld [vmem:[%s4852_s11] sm:$0xff] }
 0x4ba   : > { %3221 = vmatprep.subr.mxu1 %v2221_v40 }
 0x4bb   : > { %v2080_v57 = vsel %vm1756_vm7, %v2042_v11, 0.0  ;;  %v2041_v53 = vmul.f32 %v4636_v55, %v4636_v55  ;;  %3222 = vmatpush3.msra.mxu1 %v2221_v40 }
 0x4bc   : > { %v1991_v54 = vpop.xlane.xlu1 %1990  ;;  %2081 = vadd.xlane.f32.xlu1 %v2080_v57  ;;  %3303 = vmatprep.subr.mxu1 %v4909_v48 }
 0x4bd   : > { %v2012_v62 = vmul.f32 0.03125, %v1991_v54  ;;  %v2077_v34 = vsel %vm1756_vm7, %v2041_v53, 0.0 }
 0x4be   : > { %2078 = vadd.xlane.f32.xlu0 %v2077_v34  ;;  %v1988_v28 = vpop.xlane.xlu0 %1987  ;;  %v4678_v34 = vld [vmem:[%s4850_s9] ss:$0 sm:$0xff] }
 0x4bf   : > { %v4651_v24 = vsub.f32 %v4550_v35, %v2012_v62  ;;  %v2011_v15 = vmul.f32 0.03125, %v1988_v28 }
 0x4c1   : > { %v4655_v31 = vsub.f32 %v4552_v18, %v2011_v15  ;;  %v2044_v21 = vmul.f32 %v4651_v24, %v4651_v24 }
 0x4c3   : > { %v2086_v23 = vsel %vm1756_vm7, %v2044_v21, 0.0  ;;  %v2043_v12 = vmul.f32 %v4655_v31, %v4655_v31 }
 0x4c4   : > { %2087 = vadd.xlane.f32.xlu1 %v2086_v23  ;;  %v1997_v1 = vpop.xlane.xlu1 %1996 }
 0x4c5   : > { %v2014_v19 = vmul.f32 0.03125, %v1997_v1  ;;  %v2083_v35 = vsel %vm1756_vm7, %v2043_v12, 0.0 }
 0x4c6   : > { %2084 = vadd.xlane.f32.xlu0 %v2083_v35  ;;  %v1994_v42 = vpop.xlane.xlu0 %1993 }
 0x4c7   : > { %v4664_v45 = vsub.f32 %v4558_v33, %v2014_v19  ;;  %v2013_v18 = vmul.f32 0.03125, %v1994_v42  ;;  %v4686_v42 = vld [vmem:[%s4851_s10] ss:$0 sm:$0xff] }
 0x4c9   : > { %v4667_v17 = vsub.f32 %v4560_v63, %v2013_v18  ;;  %v2046_v26 = vmul.f32 %v4664_v45, %v4664_v45 }
 0x4cb   : > { %v2092_v41 = vsel %vm1756_vm7, %v2046_v26, 0.0  ;;  %v2045_v56 = vmul.f32 %v4667_v17, %v4667_v17 }
 0x4cc   : > { %2093 = vadd.xlane.f32.xlu1 %v2092_v41 }
 0x4cd   : > { %v2089_v37 = vsel %vm1756_vm7, %v2045_v56, 0.0 }
 0x4ce   : > { %2090 = vadd.xlane.f32.xlu0 %v2089_v37 }
 0x51d   : > { %v2052_v44 = vpop.xlane.xlu1 %2051 }
 0x51e   : > { %v2096_v2 = vmul.f32 0.03125, %v2052_v44 }
 0x51f   : > { %v2049_v33 = vpop.xlane.xlu0 %2048 }
 0x520   : > { %v2112_v58 = vadd.f32 1e-05, %v2096_v2  ;;  %v2095_v14 = vmul.f32 0.03125, %v2049_v33 }
 0x522   : > { %3421 = vrsqrt.f32 %v2112_v58  ;;  %v2111_v63 = vadd.f32 1e-05, %v2095_v14 }
 0x524   : > { %3423 = vrsqrt.f32 %v2111_v63 }
 0x525   : > { %v2058_v47 = vpop.xlane.xlu1 %2057 }
 0x526   : > { %v2098_v32 = vmul.f32 0.03125, %v2058_v47 }
 0x527   : > { %v2055_v11 = vpop.xlane.xlu0 %2054 }
 0x528   : > { %v2114_v30 = vadd.f32 1e-05, %v2098_v32  ;;  %v2097_v57 = vmul.f32 0.03125, %v2055_v11 }
 0x52a   : > { %3425 = vrsqrt.f32 %v2114_v30  ;;  %v2113_v53 = vadd.f32 1e-05, %v2097_v57 }
 0x52c   : > { %3427 = vrsqrt.f32 %v2113_v53 }
 0x52d   : > { %v2064_v54 = vpop.xlane.xlu1 %2063 }
 0x52e   : > { %v2100_v40 = vmul.f32 0.03125, %v2064_v54 }
 0x52f   : > { %v3422_v62 = vpop.eup %3421  ;;  %v2061_v28 = vpop.xlane.xlu0 %2060 }
 0x530   : > { %v2144_v15 = vmul.f32 %v3422_v62, %v4567_v39  ;;  %v2116_v21 = vadd.f32 1e-05, %v2100_v40  ;;  %v2099_v23 = vmul.f32 0.03125, %v2061_v28 }
 0x531   : > { %v3424_v12 = vpop.eup %3423 }
 0x532   : > { %v2167_v1 = vmul.f32 %v4678_v34, %v2144_v15  ;;  %3429 = vrsqrt.f32 %v2116_v21  ;;  %v2115_v19 = vadd.f32 1e-05, %v2099_v23  ;;  %v2143_v35 = vmul.f32 %v3424_v12, %v4570_v6 }
 0x534   : > { %3431 = vrsqrt.f32 %v2115_v19  ;;  %v2166_v18 = vmul.f32 %v4678_v34, %v2143_v35  ;;  %v2190_v39 = vadd.f32 %v4686_v42, %v2167_v1 }
 0x535   : > { %v2070_v26 = vpop.xlane.xlu1 %2069 }
 0x536   : > { %v2102_v41 = vmul.f32 0.03125, %v2070_v26  ;;  %v2189_v56 = vadd.f32 %v4686_v42, %v2166_v18  ;;  %v2206_v63 = vmax.f32 %v2190_v39, 0.0 }
 0x537   : > { %v3426_v37 = vpop.eup %3425  ;;  %v2067_v44 = vpop.xlane.xlu0 %2066 }
 0x538   : > { %v2118_v2 = vadd.f32 1e-05, %v2102_v41  ;;  %v2101_v33 = vmul.f32 0.03125, %v2067_v44  ;;  %v2205_v58 = vmax.f32 %v2189_v56, 0.0  ;;  %v2146_v6 = vmul.f32 %v3426_v37, %v4579_v61 }
 0x539   : > { %v3428_v14 = vpop.eup %3427 }
 0x53a   : > { %3433 = vrsqrt.f32 %v2118_v2  ;;  %v2117_v47 = vadd.f32 1e-05, %v2101_v33  ;;  %3223 = vmatprep.mubr.msk.f32.mxu1 %vm1756_vm7, %v2205_v58  ;;  %v2145_v32 = vmul.f32 %v3428_v14, %v4582_v22  ;;  %v2169_v11 = vmul.f32 %v4678_v34, %v2146_v6 }
 0x53b   : > { %3224 = vmatmul.mubr.msk.f32.vlgmr.msra.gmra.mxu1 %vm1756_vm7, %v2206_v63 }
 0x53c   : > { %3435 = vrsqrt.f32 %v2117_v47  ;;  %v2168_v30 = vmul.f32 %v4678_v34, %v2145_v32  ;;  %v2192_v53 = vadd.f32 %v4686_v42, %v2169_v11 }
 0x53d   : > { %v2076_v57 = vpop.xlane.xlu1 %2075 }
 0x53e   : > { %v2104_v54 = vmul.f32 0.03125, %v2076_v57  ;;  %v2191_v61 = vadd.f32 %v4686_v42, %v2168_v30  ;;  %v2208_v12 = vmax.f32 %v2192_v53, 0.0 }
 0x53f   : > { %v3430_v40 = vpop.eup %3429  ;;  %v2073_v62 = vpop.xlane.xlu0 %2072 }
 0x540   : > { %v2120_v28 = vadd.f32 1e-05, %v2104_v54  ;;  %v2103_v15 = vmul.f32 0.03125, %v2073_v62  ;;  %v2207_v21 = vmax.f32 %v2191_v61, 0.0  ;;  %v2148_v22 = vmul.f32 %v3430_v40, %v4591_v36 }
 0x541   : > { %v3432_v23 = vpop.eup %3431 }
 0x542   : > { %3437 = vrsqrt.f32 %v2120_v28  ;;  %v2119_v1 = vadd.f32 1e-05, %v2103_v15  ;;  %3226 = vmatprep.mubr.msk.f32.mxu1 %vm1756_vm7, %v2207_v21  ;;  %v2147_v19 = vmul.f32 %v3432_v23, %v4594_v9  ;;  %v2171_v35 = vmul.f32 %v4678_v34, %v2148_v22 }
 0x543   : > { %3227 = vmatmul.mubr.msk.f32.gmra.mxu1 %vm1756_vm7, %v2208_v12 }
 0x544   : > { %3439 = vrsqrt.f32 %v2119_v1  ;;  %v2170_v18 = vmul.f32 %v4678_v34, %v2147_v19  ;;  %v2194_v39 = vadd.f32 %v4686_v42, %v2171_v35 }
 0x545   : > { %v2082_v26 = vpop.xlane.xlu1 %2081 }
 0x546   : > { %v2106_v41 = vmul.f32 0.03125, %v2082_v26  ;;  %v2193_v36 = vadd.f32 %v4686_v42, %v2170_v18  ;;  %v2210_v6 = vmax.f32 %v2194_v39, 0.0 }
 0x547   : > { %v3434_v56 = vpop.eup %3433  ;;  %v2079_v37 = vpop.xlane.xlu0 %2078 }
 0x548   : > { %v2122_v44 = vadd.f32 1e-05, %v2106_v41  ;;  %v2105_v2 = vmul.f32 0.03125, %v2079_v37  ;;  %v2209_v33 = vmax.f32 %v2193_v36, 0.0  ;;  %v2150_v9 = vmul.f32 %v3434_v56, %v4603_v10 }
 0x549   : > { %v3436_v58 = vpop.eup %3435 }
 0x54a   : > { %3441 = vrsqrt.f32 %v2122_v44  ;;  %v2121_v14 = vadd.f32 1e-05, %v2105_v2  ;;  %3229 = vmatprep.mubr.msk.f32.mxu1 %vm1756_vm7, %v2209_v33  ;;  %v2149_v63 = vmul.f32 %v3436_v58, %v4606_v0  ;;  %v2173_v47 = vmul.f32 %v4678_v34, %v2150_v9 }
 0x54b   : > { %3230 = vmatmul.mubr.msk.f32.gmra.mxu1 %vm1756_vm7, %v2210_v6 }
 0x54c   : > { %3443 = vrsqrt.f32 %v2121_v14  ;;  %v2172_v32 = vmul.f32 %v4678_v34, %v2149_v63  ;;  %v2196_v30 = vadd.f32 %v4686_v42, %v2173_v47 }
 0x54d   : > { %v2088_v11 = vpop.xlane.xlu1 %2087 }
 0x54e   : > { %v2108_v57 = vmul.f32 0.03125, %v2088_v11  ;;  %v2195_v10 = vadd.f32 %v4686_v42, %v2172_v32  ;;  %v2212_v15 = vmax.f32 %v2196_v30, 0.0 }
 0x54f   : > { %v3438_v53 = vpop.eup %3437  ;;  %v2085_v54 = vpop.xlane.xlu0 %2084 }
 0x550   : > { %v2124_v61 = vadd.f32 1e-05, %v2108_v57  ;;  %v2107_v40 = vmul.f32 0.03125, %v2085_v54  ;;  %v2211_v62 = vmax.f32 %v2195_v10, 0.0  ;;  %v2152_v0 = vmul.f32 %v3438_v53, %v4615_v49 }
 0x551   : > { %v3440_v28 = vpop.eup %3439 }
 0x552   : > { %3445 = vrsqrt.f32 %v2124_v61  ;;  %v2123_v21 = vadd.f32 1e-05, %v2107_v40  ;;  %3232 = vmatprep.mubr.msk.f32.mxu1 %vm1756_vm7, %v2211_v62  ;;  %v2151_v22 = vmul.f32 %v3440_v28, %v4618_v60  ;;  %v2175_v23 = vmul.f32 %v4678_v34, %v2152_v0 }
 0x553   : > { %3233 = vmatmul.mubr.msk.f32.gmra.mxu1 %vm1756_vm7, %v2212_v15 }
 0x554   : > { %3447 = vrsqrt.f32 %v2123_v21  ;;  %v2174_v12 = vmul.f32 %v4678_v34, %v2151_v22  ;;  %v2198_v19 = vadd.f32 %v4686_v42, %v2175_v23 }
 0x555   : > { %v2094_v1 = vpop.xlane.xlu1 %2093 }
 0x556   : > { %v2110_v35 = vmul.f32 0.03125, %v2094_v1  ;;  %v2197_v49 = vadd.f32 %v4686_v42, %v2174_v12  ;;  %v2214_v37 = vmax.f32 %v2198_v19, 0.0 }
 0x557   : > { %v3442_v18 = vpop.eup %3441  ;;  %v2091_v26 = vpop.xlane.xlu0 %2090 }
 0x558   : > { %v2126_v39 = vadd.f32 1e-05, %v2110_v35  ;;  %v2109_v41 = vmul.f32 0.03125, %v2091_v26  ;;  %v2213_v36 = vmax.f32 %v2197_v49, 0.0  ;;  %v2154_v60 = vmul.f32 %v3442_v18, %v4633_v50 }
 0x559   : > { %v3444_v56 = vpop.eup %3443 }
 0x55a   : > { %3449 = vrsqrt.f32 %v2126_v39  ;;  %v2125_v44 = vadd.f32 1e-05, %v2109_v41  ;;  %3235 = vmatprep.mubr.msk.f32.mxu1 %vm1756_vm7, %v2213_v36  ;;  %v2153_v2 = vmul.f32 %v3444_v56, %v4636_v55  ;;  %v2177_v33 = vmul.f32 %v4678_v34, %v2154_v60 }
 0x55b   : > { %3236 = vmatmul.mubr.msk.f32.gmra.mxu1 %vm1756_vm7, %v2214_v37 }
 0x55c   : > { %3451 = vrsqrt.f32 %v2125_v44  ;;  %v2176_v9 = vmul.f32 %v4678_v34, %v2153_v2  ;;  %v2200_v58 = vadd.f32 %v4686_v42, %v2177_v33 }
 0x55e   : > { %v2199_v6 = vadd.f32 %v4686_v42, %v2176_v9  ;;  %v2216_v32 = vmax.f32 %v2200_v58, 0.0 }
 0x55f   : > { %v3446_v50 = vpop.eup %3445 }
 0x560   : > { %v2215_v14 = vmax.f32 %v2199_v6, 0.0  ;;  %v2156_v63 = vmul.f32 %v3446_v50, %v4651_v24 }
 0x561   : > { %v3448_v47 = vpop.eup %3447 }
 0x562   : > { %3238 = vmatprep.mubr.msk.f32.mxu1 %vm1756_vm7, %v2215_v14  ;;  %v2155_v55 = vmul.f32 %v3448_v47, %v4655_v31  ;;  %v2179_v11 = vmul.f32 %v4678_v34, %v2156_v63 }
 0x563   : > { %3239 = vmatmul.mubr.msk.f32.gmra.mxu1 %vm1756_vm7, %v2216_v32 }
 0x564   : > { %v2178_v30 = vmul.f32 %v4678_v34, %v2155_v55  ;;  %v2202_v57 = vadd.f32 %v4686_v42, %v2179_v11 }
 0x566   : > { %v2201_v10 = vadd.f32 %v4686_v42, %v2178_v30  ;;  %v2218_v40 = vmax.f32 %v2202_v57, 0.0 }
 0x567   : > { %v3450_v53 = vpop.eup %3449 }
 0x568   : > { %v2217_v54 = vmax.f32 %v2201_v10, 0.0  ;;  %v2158_v24 = vmul.f32 %v3450_v53, %v4664_v45  ;;  %v2588_v53 = vadd.s32 1, %v3680_v29 }
 0x569   : > { %v3452_v61 = vpop.eup %3451 }
 0x56a   : > { %3241 = vmatprep.mubr.msk.f32.mxu1 %vm1756_vm7, %v2217_v54  ;;  %v2157_v31 = vmul.f32 %v3452_v61, %v4667_v17  ;;  %v2181_v62 = vmul.f32 %v4678_v34, %v2158_v24 }
 0x56b   : > { %3242 = vmatmul.mubr.msk.f32.gmra.mxu1 %vm1756_vm7, %v2218_v40 }
 0x56c   : > { %v2180_v0 = vmul.f32 %v4678_v34, %v2157_v31  ;;  %v2204_v28 = vadd.f32 %v4686_v42, %v2181_v62  ;;  %v2586_v31 = vmul.u32 16, %v3680_v29  ;;  %v2589_v62 = vmul.u32 16, %v2588_v53 }
 0x56e   : > { %v2203_v15 = vadd.f32 %v4686_v42, %v2180_v0  ;;  %v2220_v22 = vmax.f32 %v2204_v28, 0.0  ;;  %vm4786_vm1 = vcmp.ge.s32.totalorder %v4341_v7, %v2586_v31  ;;  %vm2590_vm9 = vcmp.lt.s32.totalorder %v4341_v7, %v2589_v62 }
 0x56f   : > { %vm2591_vm10 = vmand %vm4786_vm1, %vm2590_vm9 }
 0x570   : > { %v2219_v21 = vmax.f32 %v2203_v15, 0.0 }
 0x572   : > { %3244 = vmatprep.mubr.msk.f32.mxu1 %vm1756_vm7, %v2219_v21 }
 0x573   : > { %3245 = vmatmul.mubr.msk.f32.gmra.mxu1 %vm1756_vm7, %v2220_v22 }
 0x574   : > { %3335 = vmatprep.mubr.msk.f32.mxu1 %vm3517_vm8, %v4909_v48 }
 0x5fb   : > { %v3225_v45 = vpop.f32.mrf.mxu1 }
 0x5fd   : > { %v2339_v23 = vpop.f32.mrf.mxu1 }
 0x603   : > { %v3228_v12 = vpop.f32.mrf.mxu1 }
 0x605   : > { %v2349_v17 = vpop.f32.mrf.mxu1 }
 0x60b   : > { %v3231_v1 = vpop.f32.mrf.mxu1 }
 0x60d   : > { %v2359_v19 = vpop.f32.mrf.mxu1 }
 0x613   : > { %v3234_v35 = vpop.f32.mrf.mxu1 }
 0x615   : > { %v2369_v49 = vpop.f32.mrf.mxu1 }
 0x61b   : > { %v3237_v18 = vpop.f32.mrf.mxu1 }
 0x61d   : > { %v2379_v34 = vpop.f32.mrf.mxu1 }
 0x623   : > { %v3240_v26 = vpop.f32.mrf.mxu1 }
 0x625   : > { %v2389_v39 = vpop.f32.mrf.mxu1 }
 0x62b   : > { %v3243_v41 = vpop.f32.mrf.mxu1 }
 0x62d   : > { %v2399_v42 = vpop.f32.mrf.mxu1 }
 0x633   : > { %v3246_v36 = vpop.f32.mrf.mxu1 }
 0x634   : > { %3247 = vmatprep.subr.mxu0 %v3246_v36 }
 0x635   : > { %v2409_v60 = vpop.f32.mrf.mxu1  ;;  %3248 = vmatpush3.msra.mxu0 %v3246_v36 }
 0x636   : > { %3249 = vmatprep.subr.mxu0 %v2409_v60 }
 0x637   : > { %3250 = vmatpush3.msra.mxu0 %v2409_v60 }
 0x638   : > { %3251 = vmatprep.subr.mxu0 %v3243_v41 }
 0x639   : > { %3252 = vmatpush3.msra.mxu0 %v3243_v41 }
 0x63a   : > { %3253 = vmatprep.subr.mxu0 %v2399_v42 }
 0x63b   : > { %3254 = vmatpush3.msra.mxu0 %v2399_v42  ;;  %v2677_v42 = vstv %s2676_s20 }
 0x63c   : > { %3255 = vmatprep.subr.mxu0 %v3240_v26 }
 0x63d   : > { %3256 = vmatpush3.msra.mxu0 %v3240_v26 }
 0x63e   : > { %3257 = vmatprep.subr.mxu0 %v2389_v39 }
 0x63f   : > { %3258 = vmatpush3.msra.mxu0 %v2389_v39 }
 0x640   : > { %3259 = vmatprep.subr.mxu0 %v3237_v18 }
 0x641   : > { %3260 = vmatpush3.msra.mxu0 %v3237_v18  ;;  %v2956_v18 = vld [vmem:[%s4854_s13] ss:$0 sm:$0xff] }
 0x642   : > { %3261 = vmatprep.subr.mxu0 %v2379_v34 }
 0x643   : > { %3262 = vmatpush3.msra.mxu0 %v2379_v34 }
 0x644   : > { %3263 = vmatprep.subr.mxu0 %v3234_v35 }
 0x645   : > { %3264 = vmatpush3.msra.mxu0 %v3234_v35 }
 0x646   : > { %3265 = vmatprep.subr.mxu0 %v2369_v49 }
 0x647   : > { %3266 = vmatpush3.msra.mxu0 %v2369_v49 }
 0x648   : > { %3267 = vmatprep.subr.mxu0 %v3231_v1 }
 0x649   : > { %3268 = vmatpush3.msra.mxu0 %v3231_v1  ;;  %v2955_v1 = vsel %vm2591_vm10, 1.0, %v4909_v48 }
 0x64a   : > { %3269 = vmatprep.subr.mxu0 %v2359_v19  ;;  %v2594_v35 = vmul.f32 0.0625, %v2955_v1 }
 0x64b   : > { %3270 = vmatpush3.msra.mxu0 %v2359_v19 }
 0x64c   : > { %3271 = vmatprep.subr.mxu0 %v3228_v12 }
 0x64d   : > { %3272 = vmatpush3.msra.mxu0 %v3228_v12 }
 0x64e   : > { %3273 = vmatprep.subr.mxu0 %v2349_v17 }
 0x64f   : > { %3274 = vmatpush3.msra.mxu0 %v2349_v17 }
 0x650   : > { %3275 = vmatprep.subr.mxu0 %v3225_v45 }
 0x651   : > { %3276 = vmatpush3.msra.mxu0 %v3225_v45 }
 0x652   : > { %3277 = vmatprep.subr.mxu0 %v2339_v23 }
 0x653   : > { %3278 = vmatpush3.msra.mxu0 %v2339_v23 }
 0x654   : > { %3280 = vmatmul.mubr.f32.vlgmr.msra.gmra.mxu0 %v4358_v3 }
 0x655   : > { %3282 = vmatprep.mubr.f32.mxu0 %v4366_v16 }
 0x658   : > { %3283 = vmatmul.mubr.f32.gmra.mxu0 %v4374_v46 }
 0x659   : > { %3285 = vmatprep.mubr.f32.mxu0 %v4382_v38 }
 0x65c   : > { %3286 = vmatmul.mubr.f32.gmra.mxu0 %v4390_v8 }
 0x65d   : > { %3288 = vmatprep.mubr.f32.mxu0 %v4398_v43 }
 0x660   : > { %3289 = vmatmul.mubr.f32.gmra.mxu0 %v4406_v27 }
 0x661   : > { %3291 = vmatprep.mubr.f32.mxu0 %v4414_v4 }
 0x664   : > { %3292 = vmatmul.mubr.f32.gmra.mxu0 %v4422_v25 }
 0x665   : > { %3294 = vmatprep.mubr.f32.mxu0 %v4430_v5 }
 0x668   : > { %3295 = vmatmul.mubr.f32.gmra.mxu0 %v4438_v13 }
 0x669   : > { %3297 = vmatprep.mubr.f32.mxu0 %v4446_v51 }
 0x66c   : > { %3298 = vmatmul.mubr.f32.gmra.mxu0 %v4454_v20 }
 0x66d   : > { %3300 = vmatprep.mubr.f32.mxu0 %v4462_v52 }
 0x670   : > { %3301 = vmatmul.mubr.f32.gmra.mxu0 %v4465_v59  ;;  %v2954_v59 = vld [vmem:[%s4853_s12] ss:$0 sm:$0xff] }
 0x714   : > { %v4765_v3 = vpop.f32.mrf.mxu0 }
 0x715   : > { %v2497_v23 = vadd.f32 %v4765_v3, %v2954_v59 }
 0x716   : > { %v4767_v16 = vpop.f32.mrf.mxu0 }
 0x717   : > { %v2492_v17 = vadd.f32 %v2954_v59, %v4767_v16  ;;  %v2571_v19 = vmax.f32 %v2497_v23, 0.0 }
 0x718   : > { %v3284_v46 = vpop.f32.mrf.mxu0 }
 0x719   : > { %v2507_v15 = vadd.f32 %v3284_v46, %v2954_v59  ;;  %v2570_v49 = vmax.f32 %v2492_v17, 0.0 }
 0x71a   : > { %v4769_v38 = vpop.f32.mrf.mxu0 }
 0x71b   : > { %v2502_v29 = vadd.f32 %v2954_v59, %v4769_v38  ;;  %v2573_v12 = vmax.f32 %v2507_v15, 0.0 }
 0x71c   : > { %v3287_v8 = vpop.f32.mrf.mxu0 }
 0x71d   : > { %v2517_v61 = vadd.f32 %v3287_v8, %v2954_v59  ;;  %v2572_v7 = vmax.f32 %v2502_v29, 0.0 }
 0x71e   : > { %v2511_v43 = vpop.f32.mrf.mxu0 }
 0x71f   : > { %v2512_v0 = vadd.f32 %v2954_v59, %v2511_v43  ;;  %v2575_v21 = vmax.f32 %v2517_v61, 0.0 }
 0x720   : > { %v3290_v27 = vpop.f32.mrf.mxu0 }
 0x721   : > { %v2527_v57 = vadd.f32 %v3290_v27, %v2954_v59  ;;  %v2574_v45 = vmax.f32 %v2512_v0, 0.0 }
 0x722   : > { %v2521_v4 = vpop.f32.mrf.mxu0 }
 0x723   : > { %v2522_v54 = vadd.f32 %v2954_v59, %v2521_v4  ;;  %v2577_v40 = vmax.f32 %v2527_v57, 0.0 }
 0x724   : > { %v3293_v25 = vpop.f32.mrf.mxu0 }
 0x725   : > { %v2537_v32 = vadd.f32 %v3293_v25, %v2954_v59  ;;  %v2576_v28 = vmax.f32 %v2522_v54, 0.0 }
 0x726   : > { %v2531_v5 = vpop.f32.mrf.mxu0 }
 0x727   : > { %v2532_v11 = vadd.f32 %v2954_v59, %v2531_v5  ;;  %v2579_v10 = vmax.f32 %v2537_v32, 0.0 }
 0x728   : > { %v3296_v13 = vpop.f32.mrf.mxu0 }
 0x729   : > { %v2547_v50 = vadd.f32 %v3296_v13, %v2954_v59  ;;  %v2578_v24 = vmax.f32 %v2532_v11, 0.0 }
 0x72a   : > { %v2541_v51 = vpop.f32.mrf.mxu0 }
 0x72b   : > { %v2542_v63 = vadd.f32 %v2954_v59, %v2541_v51  ;;  %v2581_v55 = vmax.f32 %v2547_v50, 0.0 }
 0x72c   : > { %v3299_v20 = vpop.f32.mrf.mxu0 }
 0x72d   : > { %v2557_v2 = vadd.f32 %v3299_v20, %v2954_v59  ;;  %v2580_v30 = vmax.f32 %v2542_v63, 0.0 }
 0x72e   : > { %v2551_v52 = vpop.f32.mrf.mxu0 }
 0x72f   : > { %v2552_v58 = vadd.f32 %v2954_v59, %v2551_v52  ;;  %v2583_v14 = vmax.f32 %v2557_v2, 0.0 }
 0x730   : > { %v3302_v56 = vpop.f32.mrf.mxu0 }
 0x731   : > { %v2567_v37 = vadd.f32 %v3302_v56, %v2954_v59  ;;  %v2582_v47 = vmax.f32 %v2552_v58, 0.0 }
 0x732   : > { %v2561_v44 = vpop.f32.mrf.mxu0 }
 0x733   : > { %v2585_v33 = vmax.f32 %v2567_v37, 0.0  ;;  %v2562_v9 = vadd.f32 %v2954_v59, %v2561_v44 }
 0x735   : > { %v2584_v6 = vmax.f32 %v2562_v9, 0.0  ;;  %3304 = vmatpush3.msra.mxu1 %v2585_v33 }
 0x736   : > { %3305 = vmatprep.subr.mxu1 %v4909_v48 }
 0x737   : > { %3306 = vmatpush3.msra.mxu1 %v2584_v6 }
 0x738   : > { %3307 = vmatprep.subr.mxu1 %v4909_v48 }
 0x739   : > { %3308 = vmatpush3.msra.mxu1 %v2583_v14 }
 0x73a   : > { %3309 = vmatprep.subr.mxu1 %v4909_v48 }
 0x73b   : > { %3310 = vmatpush3.msra.mxu1 %v2582_v47 }
 0x73c   : > { %3311 = vmatprep.subr.mxu1 %v4909_v48 }
 0x73d   : > { %3312 = vmatpush3.msra.mxu1 %v2581_v55 }
 0x73e   : > { %3313 = vmatprep.subr.mxu1 %v4909_v48 }
 0x73f   : > { %3314 = vmatpush3.msra.mxu1 %v2580_v30 }
 0x740   : > { %3315 = vmatprep.subr.mxu1 %v4909_v48 }
 0x741   : > { %3316 = vmatpush3.msra.mxu1 %v2579_v10 }
 0x742   : > { %3317 = vmatprep.subr.mxu1 %v4909_v48 }
 0x743   : > { %3318 = vmatpush3.msra.mxu1 %v2578_v24 }
 0x744   : > { %3319 = vmatprep.subr.mxu1 %v4909_v48 }
 0x745   : > { %3320 = vmatpush3.msra.mxu1 %v2577_v40 }
 0x746   : > { %3321 = vmatprep.subr.mxu1 %v4909_v48 }
 0x747   : > { %3322 = vmatpush3.msra.mxu1 %v2576_v28 }
 0x748   : > { %3323 = vmatprep.subr.mxu1 %v4909_v48 }
 0x749   : > { %3324 = vmatpush3.msra.mxu1 %v2575_v21 }
 0x74a   : > { %3325 = vmatprep.subr.mxu1 %v4909_v48 }
 0x74b   : > { %3326 = vmatpush3.msra.mxu1 %v2574_v45 }
 0x74c   : > { %3327 = vmatprep.subr.mxu1 %v4909_v48 }
 0x74d   : > { %3328 = vmatpush3.msra.mxu1 %v2573_v12 }
 0x74e   : > { %3329 = vmatprep.subr.mxu1 %v4909_v48 }
 0x74f   : > { %3330 = vmatpush3.msra.mxu1 %v2572_v7 }
 0x750   : > { %3331 = vmatprep.subr.mxu1 %v4909_v48 }
 0x751   : > { %3332 = vmatpush3.msra.mxu1 %v2571_v19 }
 0x752   : > { %3333 = vmatprep.subr.mxu1 %v4909_v48 }
 0x753   : > { %3334 = vmatpush3.msra.mxu1 %v2570_v49 }
 0x754   : > { %3336 = vmatmul.mubr.f32.vlgmr.msra.gmra.mxu1 %v2594_v35 }
 0x814   : > { %v2661_v34 = vpop.f32.mrf.mxu1 }
 0x815   : > { %v2672_v26 = vmul.f32 %v2956_v18, %v2661_v34 }
 0x816   : > { %v3337_v39 = vpop.f32.mrf.mxu1 }
 0x817   : > { %v2673_v41 = vsel %vm1756_vm7, %v2672_v26, 0.0 }
 0x818   : > { %2674 = vadd.xlane.f32.xlu0 %v2673_v41 }
 0x8a1   : > { %v2675_v48 = vpop.xlane.xlu0 %2674 }
 0x8a2   : > { %v2678_v36 = vadd.f32 %v2677_v42, %v2675_v48 }
 0x8a4   : > { %2679 = vst [vmem:[%s520_s3] sm:$0xff] %v2678_v36 }
 0x8a5   : > { %3466 = shalt.err (!%p3463_p4)
}
 0x8a6   : > { %s3467_s20 = scalar_lea.hbm %s2692_s19, 128  ;;  %s3471_s21 = scalar_lea.hbm %s4856_s15, 512 }
 0x8a7   : > { %p3468_p7 = scmp.ne.s32.totalorder %s2692_s19, %s3467_s20  ;;  %p3472_p10 = scmp.lt.s32.totalorder %s2692_s19, %s4856_s15 }
 0x8a8   : > { %p3473_p11 = scmp.lt.s32.totalorder %s3471_s21, %s3467_s20 }
 0x8a9   : > { %p3469_p8 = pnand %p3468_p7, %p3643_p5 }
 0x8aa   : > { %p3474_p12 = por %p3473_p11, %p3472_p10 }
 0x8ab   : > { %p3470_p9 = pneg %p3469_p8 }
 0x8ad   : > { %p3475_p13 = pnand %p3474_p12, %p3470_p9 }
 0x8af   : > { %3478 = shalt.err (!%p3475_p13)
}
 0x8b0   : > { %3338 = dma.vmem_to_hbm [thread:$0]  (%p3643_p5), %s2695_s27, 128, %s2692_s19, %s2681_s17  }
 0x8b1 PF: > { %p3344_p0 = scmp.ge.s32.totalorder %s3513_s25, 2  ;;  %s2706_s1 = sand.u32 1, %s3501_s22  }
 0x8b2   : > { %s2707_s2 = scalar_lea.sflag [#allocation5], %s2706_s1 }
 0x8b3   : > { %p3341_p1 = pnand %p3344_p0, %p3647_p6 }
 0x8b5   : > { %p3342_p2 = pneg %p3341_p1 }
 0x8b7   : > { %3496 = dma.done.wait (%p3342_p2), %s2707_s2, 128  }
 0x8b8   : > { %3498 = vsyncadd (%p3342_p2), %s2707_s2, 4294967168  ;;  %p27_p3 = scmp.ge.s32.totalorder %s3630_s26, 6   ;;  %s4934_s22 = smov %s3505_s23 }
 0x8b9   : > { %s4935_s23 = smov %s3509_s24  ;;  %s4936_s24 = smov %s3641_s29 }
 0x8ba   : > { %s4937_s25 = smov %s3630_s26  ;;  %29 = sbr.rel (!%p27_p3) target bundleno = 11 (0xb), region = 121 }
 0x8bf   :  { %2712 = vsyncpa [#allocation5], 1 }
 0x8c0   :  { %2714 = vsyncpa [#allocation5 + $0x1], 1 }

</bundles_post_ra>
